<compile_context>
chip_gen: v7x
topology: tpu7x:2x2x1
jax: 0.10.0
libtpu: 0.0.40
codegen_flags: <defaults>
</compile_context>

<pallas_src>
from functools import partial

import jax
import jax.numpy as jnp
from jax.experimental import pallas as pl
from jax.experimental.pallas import tpu as pltpu


# ----------------------------------------------------------------------------
# In-kernel 2x2 stride-2 max-pool of a (rh*2*W, C) tile (rows are row-major h,w)
# ----------------------------------------------------------------------------
def _pool2x2(v, rh, W):
    WP = W // 2
    C = v.shape[-1]
    v = v.reshape(rh, 2, W, C)
    v = jnp.maximum(v[:, 0], v[:, 1])            # vertical max   -> (rh, W, C)
    v = v.reshape(rh, WP, 2, C)
    v = jnp.maximum(v[:, :, 0], v[:, :, 1])      # horizontal max -> (rh, WP, C)
    return v.reshape(rh * WP, C)


# ----------------------------------------------------------------------------
# Kernel: partial conv (im2col matmul) + normalize + bias + LeakyReLU + maxpool
# ----------------------------------------------------------------------------
def pconv_pool_kernel(p_ref, msum_ref, w_ref, b_ref, x_out_ref, m_out_ref,
                      *, ck, lr, rh, W, pool):
    # p_ref:    (1, TM, CK) bf16  im2col patches of (x * mask)
    # msum_ref: (1, TM, 1)  f32   per-pixel mask window sums
    # w_ref:    (CK, Cp)    bf16  (Cout zero-padded to Cp = 128k lanes)
    # b_ref:    (1, Cp)     f32
    conv = jnp.dot(p_ref[0], w_ref[...],
                   preferred_element_type=jnp.float32)          # (TM, Cp) f32

    msum = msum_ref[0]                                          # (TM, 1)
    valid = msum > 0.0
    ratio = ck / jnp.where(valid, msum, 1.0)                    # (TM, 1)

    out = jnp.where(valid, conv * ratio + b_ref[...], 0.0)      # (TM, Cp)
    out = jnp.where(out >= 0.0, out, lr * out)                  # LeakyReLU(lr)

    # new_mask is exactly 0/1 so LeakyReLU on it is a no-op (dropped).
    mcol = jnp.where(valid, 1.0, 0.0)                           # (TM, 1)

    if pool:
        out = _pool2x2(out, rh, W)                              # (TM/4, Cp)
        mcol = _pool2x2(mcol, rh, W)                            # (TM/4, 1)

    x_out_ref[0] = out.astype(x_out_ref.dtype)
    m_out_ref[0] = jnp.broadcast_to(mcol, out.shape).astype(m_out_ref.dtype)


# ----------------------------------------------------------------------------
# Tile selection: rows-per-tile is a multiple of 2*W (whole row pairs) so the
# pool fuses cleanly.  Among legal tile sizes, pick the largest whose per-tile
# VMEM footprint (patches + msum + both outputs) stays within `budget_bytes`,
# so double buffering fits the default scoped-VMEM limit on v5e/v6e/v7x while
# amortizing the ~0.35 us per-grid-step overhead.
# ----------------------------------------------------------------------------
def _pick_row_units(H, W, CK, Cp, pool, budget_bytes=3 << 20):
    unit = 2 * W if pool else W
    n_units = (H // 2) if pool else H
    shrink = 4 if pool else 1

    def tile_bytes(d):
        tm = d * unit
        to = tm // shrink
        return tm * CK * 2 + tm * 4 + 2 * to * Cp * 4

    valid = []
    for d in range(1, n_units + 1):
        if n_units % d:
            continue
        tm = d * unit
        if tm % 8:
            continue
        if pool and (tm // 4) % 8:
            continue
        valid.append(d)
    if not valid:
        return n_units                 # full-extent block is always legal
    within = [d for d in valid if tile_bytes(d) <= budget_bytes]
    return max(within) if within else min(valid)


# ----------------------------------------------------------------------------
# Wrapper (layout plumbing: padding, im2col, lane padding, NCHW<->NHWC)
# ----------------------------------------------------------------------------
def encoder_forward(x, mask, weight, bias, *, lr=0.1, maxpool=True):
    """x, mask: (N, C, H, W) float32. weight: (Cout, Cin, 3, 3). bias: (Cout,)."""
    N, C, H, W = x.shape
    Cout = weight.shape[0]
    HW = H * W
    CK = 9 * C
    Cp = max(128, ((Cout + 127) // 128) * 128)   # lane-dense padded channels

    if maxpool:
        # TODO(synk): PyTorch MaxPool2d(2,2) floors odd spatial dims; even assumed.
        assert H % 2 == 0 and W % 2 == 0

    # Encoder.forward padding: replicate for x, constant 1 for mask; NCHW->NHWC.
    xp = jnp.transpose(jnp.pad(x, ((0, 0), (0, 0), (1, 1), (1, 1)), mode="edge"),
                       (0, 2, 3, 1))
    mkp = jnp.transpose(jnp.pad(mask, ((0, 0), (0, 0), (1, 1), (1, 1)),
                                mode="constant", constant_values=1.0),
                        (0, 2, 3, 1))

    # Masked input (the only conv operand) in bf16.
    xm = (xp * mkp).astype(jnp.bfloat16)                         # (N, H+2, W+2, C)

    # im2col of masked x: (N, HW, 9*C), patch element order (kh, kw, cin).
    cols = [xm[:, dh:dh + H, dw:dw + W, :] for dh in range(3) for dw in range(3)]
    patches = jnp.concatenate(cols, axis=-1).reshape(N, HW, CK)

    # Per-pixel mask window sum: channel sum then 9 shifted adds -> (N, HW, 1).
    mch = jnp.sum(mkp, axis=-1)                                  # (N, H+2, W+2)
    msum = sum(mch[:, dh:dh + H, dw:dw + W] for dh in range(3) for dw in range(3))
    msum = msum.reshape(N, HW, 1).astype(jnp.float32)

    # weight (Cout, Cin, 3, 3) -> (kh, kw, cin, Cout) -> (CK, Cout) -> pad lanes.
    w_mat = jnp.transpose(weight, (2, 3, 1, 0)).reshape(CK, Cout)
    w_mat = jnp.pad(w_mat, ((0, 0), (0, Cp - Cout))).astype(jnp.bfloat16)
    b_mat = jnp.pad(bias.reshape(1, Cout), ((0, 0), (0, Cp - Cout))).astype(jnp.float32)

    rh = _pick_row_units(H, W, CK, Cp, maxpool)
    unit = 2 * W if maxpool else W
    TM = rh * unit
    TO = TM // 4 if maxpool else TM
    n_tiles = HW // TM
    out_rows = HW // 4 if maxpool else HW

    kern = partial(pconv_pool_kernel, ck=float(CK), lr=lr, rh=rh, W=W,
                   pool=maxpool)
    x_feat, m_feat = pl.pallas_call(
        kern,
        out_shape=(jax.ShapeDtypeStruct((N, out_rows, Cp), jnp.float32),
                   jax.ShapeDtypeStruct((N, out_rows, Cp), jnp.float32)),
        grid_spec=pltpu.PrefetchScalarGridSpec(
            num_scalar_prefetch=0,
            grid=(N, n_tiles),
            in_specs=[pl.BlockSpec((1, TM, CK), lambda n, t: (n, t, 0)),
                      pl.BlockSpec((1, TM, 1), lambda n, t: (n, t, 0)),
                      pl.BlockSpec((CK, Cp), lambda n, t: (0, 0)),
                      pl.BlockSpec((1, Cp), lambda n, t: (0, 0))],
            out_specs=[pl.BlockSpec((1, TO, Cp), lambda n, t: (n, t, 0)),
                       pl.BlockSpec((1, TO, Cp), lambda n, t: (n, t, 0))]),
        compiler_params=pltpu.CompilerParams(
            dimension_semantics=("parallel", "parallel")),
    )(patches, msum, w_mat, b_mat)

    HO, WO = (H // 2, W // 2) if maxpool else (H, W)
    x_out = jnp.transpose(x_feat[:, :, :Cout].reshape(N, HO, WO, Cout), (0, 3, 1, 2))
    m_out = jnp.transpose(m_feat[:, :, :Cout].reshape(N, HO, WO, Cout), (0, 3, 1, 2))
    return x_out, m_out


if __name__ == "__main__":
    key = jax.random.PRNGKey(0)
    k1, k2, k3, k4 = jax.random.split(key, 4)

    N, Cin, Cout, H, W = 2, 4, 8, 16, 16

    x = jax.random.normal(k1, (N, Cin, H, W), jnp.float32)
    mask = (jax.random.uniform(k2, (N, Cin, H, W)) > 0.3).astype(jnp.float32)

    # deterministic synthetic parameters (PConv2d(in=4, out=8, k=3))
    weight = jax.random.normal(k3, (Cout, Cin, 3, 3), jnp.float32) * 0.1
    bias = jax.random.normal(k4, (Cout,), jnp.float32) * 0.1

    fwd = jax.jit(partial(encoder_forward, lr=0.1, maxpool=True))
    x_out, m_out = fwd(x, mask, weight, bias)
    jax.block_until_ready((x_out, m_out))

    assert x_out.shape == (N, Cout, H // 2, W // 2)
    assert m_out.shape == (N, Cout, H // 2, W // 2)
    print("KERNEL_OK")
</pallas_src>

<mosaic_0001>
module attributes {stable_mosaic.version = 11 : i64} {
  func.func @pconv_pool_kernel(%arg0: i32, %arg1: i32, %arg2: memref<1x256x36xbf16, #tpu.memory_space<vmem>>, %arg3: memref<1x256x1xf32, #tpu.memory_space<vmem>>, %arg4: memref<36x128xbf16, #tpu.memory_space<vmem>>, %arg5: memref<1x128xf32, #tpu.memory_space<vmem>>, %arg6: memref<1x64x128xf32, #tpu.memory_space<vmem>>, %arg7: memref<1x64x128xf32, #tpu.memory_space<vmem>>) attributes {dimension_semantics = [#tpu.dimension_semantics<parallel>, #tpu.dimension_semantics<parallel>], iteration_bounds = array<i64: 2, 1>, scalar_prefetch = 0 : i64, scratch_operands = 0 : i64, tpu.core_type = #tpu.core_type<tc>, window_params = [{transform_indices = @transform_0, window_bounds = array<i64: 1, 256, 36>}, {transform_indices = @transform_1, window_bounds = array<i64: 1, 256, 1>}, {pipeline_mode = #tpu.pipeline_mode<synchronous>, transform_indices = @transform_2, window_bounds = array<i64: 36, 128>}, {pipeline_mode = #tpu.pipeline_mode<synchronous>, transform_indices = @transform_3, window_bounds = array<i64: 1, 128>}, {transform_indices = @transform_4, window_bounds = array<i64: 1, 64, 128>}, {transform_indices = @transform_5, window_bounds = array<i64: 1, 64, 128>}]} {
    %c0 = arith.constant 0 : index
    %c0_0 = arith.constant 0 : index
    %c0_1 = arith.constant 0 : index
    %0 = vector.load %arg2[%c0, %c0_0, %c0_1] : memref<1x256x36xbf16, #tpu.memory_space<vmem>>, vector<1x256x36xbf16>
    %1 = vector.shape_cast %0 : vector<1x256x36xbf16> to vector<256x36xbf16>
    %c0_2 = arith.constant 0 : index
    %c0_3 = arith.constant 0 : index
    %2 = vector.load %arg4[%c0_2, %c0_3] : memref<36x128xbf16, #tpu.memory_space<vmem>>, vector<36x128xbf16>
    %cst = arith.constant dense<0.000000e+00> : vector<256x128xf32>
    %3 = tpu.matmul %1, %2, %cst {dimension_numbers = #tpu.dot_dimension_numbers<[1], [0], [0], [1], [0, 0, 1, 1], [], []>} : vector<256x36xbf16>, vector<36x128xbf16>, vector<256x128xf32> -> vector<256x128xf32>
    %c0_4 = arith.constant 0 : index
    %c0_5 = arith.constant 0 : index
    %c0_6 = arith.constant 0 : index
    %4 = vector.load %arg3[%c0_4, %c0_5, %c0_6] : memref<1x256x1xf32, #tpu.memory_space<vmem>>, vector<1x256x1xf32>
    %5 = vector.shape_cast %4 : vector<1x256x1xf32> to vector<256x1xf32>
    %cst_7 = arith.constant 0.000000e+00 : f32
    %6 = vector.broadcast %cst_7 : f32 to vector<256x1xf32>
    %7 = arith.cmpf ogt, %5, %6 : vector<256x1xf32>
    %cst_8 = arith.constant 1.000000e+00 : f32
    %8 = vector.broadcast %cst_8 : f32 to vector<256x1xf32>
    %9 = arith.select %7, %5, %8 : vector<256x1xi1>, vector<256x1xf32>
    %cst_9 = arith.constant 3.600000e+01 : f32
    %10 = vector.broadcast %cst_9 : f32 to vector<256x1xf32>
    %11 = arith.divf %10, %9 : vector<256x1xf32>
    %12 = vector.broadcast %11 : vector<256x1xf32> to vector<256x128xf32>
    %13 = arith.mulf %3, %12 : vector<256x128xf32>
    %c0_10 = arith.constant 0 : index
    %c0_11 = arith.constant 0 : index
    %14 = vector.load %arg5[%c0_10, %c0_11] : memref<1x128xf32, #tpu.memory_space<vmem>>, vector<1x128xf32>
    %15 = vector.broadcast %14 : vector<1x128xf32> to vector<256x128xf32>
    %16 = arith.addf %13, %15 : vector<256x128xf32>
    %cst_12 = arith.constant 0.000000e+00 : f32
    %17 = vector.shape_cast %7 : vector<256x1xi1> to vector<256x1xi1>
    %18 = vector.broadcast %17 : vector<256x1xi1> to vector<256x128xi1>
    %19 = vector.broadcast %cst_12 : f32 to vector<256x128xf32>
    %20 = arith.select %18, %16, %19 : vector<256x128xi1>, vector<256x128xf32>
    %cst_13 = arith.constant 0.000000e+00 : f32
    %21 = vector.broadcast %cst_13 : f32 to vector<256x128xf32>
    %22 = arith.cmpf oge, %20, %21 : vector<256x128xf32>
    %cst_14 = arith.constant 1.000000e-01 : f32
    %23 = vector.broadcast %cst_14 : f32 to vector<256x128xf32>
    %24 = arith.mulf %23, %20 : vector<256x128xf32>
    %25 = arith.select %22, %20, %24 : vector<256x128xi1>, vector<256x128xf32>
    %cst_15 = arith.constant 1.000000e+00 : f32
    %cst_16 = arith.constant 0.000000e+00 : f32
    %26 = vector.broadcast %cst_15 : f32 to vector<256x1xf32>
    %27 = vector.broadcast %cst_16 : f32 to vector<256x1xf32>
    %28 = arith.select %7, %26, %27 : vector<256x1xi1>, vector<256x1xf32>
    %29 = vector.shape_cast %25 : vector<256x128xf32> to vector<8x2x16x128xf32>
    %30 = vector.extract_strided_slice %29 {offsets = [0, 0, 0, 0], sizes = [8, 1, 16, 128], strides = [1, 1, 1, 1]} : vector<8x2x16x128xf32> to vector<8x1x16x128xf32>
    %31 = vector.shape_cast %30 : vector<8x1x16x128xf32> to vector<8x16x128xf32>
    %32 = vector.extract_strided_slice %29 {offsets = [0, 1, 0, 0], sizes = [8, 1, 16, 128], strides = [1, 1, 1, 1]} : vector<8x2x16x128xf32> to vector<8x1x16x128xf32>
    %33 = vector.shape_cast %32 : vector<8x1x16x128xf32> to vector<8x16x128xf32>
    %34 = arith.maximumf %31, %33 : vector<8x16x128xf32>
    %35 = vector.shape_cast %34 : vector<8x16x128xf32> to vector<8x8x2x128xf32>
    %36 = vector.extract_strided_slice %35 {offsets = [0, 0, 0, 0], sizes = [8, 8, 1, 128], strides = [1, 1, 1, 1]} : vector<8x8x2x128xf32> to vector<8x8x1x128xf32>
    %37 = vector.shape_cast %36 : vector<8x8x1x128xf32> to vector<8x8x128xf32>
    %38 = vector.extract_strided_slice %35 {offsets = [0, 0, 1, 0], sizes = [8, 8, 1, 128], strides = [1, 1, 1, 1]} : vector<8x8x2x128xf32> to vector<8x8x1x128xf32>
    %39 = vector.shape_cast %38 : vector<8x8x1x128xf32> to vector<8x8x128xf32>
    %40 = arith.maximumf %37, %39 : vector<8x8x128xf32>
    %41 = vector.shape_cast %40 : vector<8x8x128xf32> to vector<64x128xf32>
    %42 = vector.shape_cast %28 : vector<256x1xf32> to vector<8x2x16x1xf32>
    %43 = vector.extract_strided_slice %42 {offsets = [0, 0, 0, 0], sizes = [8, 1, 16, 1], strides = [1, 1, 1, 1]} : vector<8x2x16x1xf32> to vector<8x1x16x1xf32>
    %44 = vector.shape_cast %43 : vector<8x1x16x1xf32> to vector<8x16x1xf32>
    %45 = vector.extract_strided_slice %42 {offsets = [0, 1, 0, 0], sizes = [8, 1, 16, 1], strides = [1, 1, 1, 1]} : vector<8x2x16x1xf32> to vector<8x1x16x1xf32>
    %46 = vector.shape_cast %45 : vector<8x1x16x1xf32> to vector<8x16x1xf32>
    %47 = arith.maximumf %44, %46 : vector<8x16x1xf32>
    %48 = vector.shape_cast %47 : vector<8x16x1xf32> to vector<8x8x2x1xf32>
    %49 = vector.extract_strided_slice %48 {offsets = [0, 0, 0, 0], sizes = [8, 8, 1, 1], strides = [1, 1, 1, 1]} : vector<8x8x2x1xf32> to vector<8x8x1x1xf32>
    %50 = vector.shape_cast %49 : vector<8x8x1x1xf32> to vector<8x8x1xf32>
    %51 = vector.extract_strided_slice %48 {offsets = [0, 0, 1, 0], sizes = [8, 8, 1, 1], strides = [1, 1, 1, 1]} : vector<8x8x2x1xf32> to vector<8x8x1x1xf32>
    %52 = vector.shape_cast %51 : vector<8x8x1x1xf32> to vector<8x8x1xf32>
    %53 = arith.maximumf %50, %52 : vector<8x8x1xf32>
    %54 = vector.shape_cast %53 : vector<8x8x1xf32> to vector<64x1xf32>
    %c0_17 = arith.constant 0 : index
    %c0_18 = arith.constant 0 : index
    %c0_19 = arith.constant 0 : index
    %55 = vector.load %arg6[%c0_17, %c0_18, %c0_19] : memref<1x64x128xf32, #tpu.memory_space<vmem>>, vector<1x64x128xf32>
    %56 = vector.shape_cast %55 : vector<1x64x128xf32> to vector<64x128xf32>
    %57 = vector.shape_cast %41 : vector<64x128xf32> to vector<1x64x128xf32>
    tpu.vector_store %arg6[%c0_17, %c0_18, %c0_19], %57 {strides = array<i32>} : memref<1x64x128xf32, #tpu.memory_space<vmem>>, vector<1x64x128xf32>,
    %58 = vector.shape_cast %54 : vector<64x1xf32> to vector<64x1xf32>
    %59 = vector.broadcast %58 : vector<64x1xf32> to vector<64x128xf32>
    %c0_20 = arith.constant 0 : index
    %c0_21 = arith.constant 0 : index
    %c0_22 = arith.constant 0 : index
    %60 = vector.load %arg7[%c0_20, %c0_21, %c0_22] : memref<1x64x128xf32, #tpu.memory_space<vmem>>, vector<1x64x128xf32>
    %61 = vector.shape_cast %60 : vector<1x64x128xf32> to vector<64x128xf32>
    %62 = vector.shape_cast %59 : vector<64x128xf32> to vector<1x64x128xf32>
    tpu.vector_store %arg7[%c0_20, %c0_21, %c0_22], %62 {strides = array<i32>} : memref<1x64x128xf32, #tpu.memory_space<vmem>>, vector<1x64x128xf32>,
    return
  }
  func.func @transform_0(%arg0: i32, %arg1: i32) -> (i32, i32, i32) {
    %c0_i32 = arith.constant 0 : i32
    %c0_i32_0 = arith.constant 0 : i32
    return %arg0, %arg1, %c0_i32 : i32, i32, i32
  }
  func.func @transform_1(%arg0: i32, %arg1: i32) -> (i32, i32, i32) {
    %c0_i32 = arith.constant 0 : i32
    %c0_i32_0 = arith.constant 0 : i32
    return %arg0, %arg1, %c0_i32 : i32, i32, i32
  }
  func.func @transform_2(%arg0: i32, %arg1: i32) -> (i32, i32) {
    %c0_i32 = arith.constant 0 : i32
    %c0_i32_0 = arith.constant 0 : i32
    %c0_i32_1 = arith.constant 0 : i32
    return %c0_i32, %c0_i32_0 : i32, i32
  }
  func.func @transform_3(%arg0: i32, %arg1: i32) -> (i32, i32) {
    %c0_i32 = arith.constant 0 : i32
    %c0_i32_0 = arith.constant 0 : i32
    %c0_i32_1 = arith.constant 0 : i32
    return %c0_i32, %c0_i32_0 : i32, i32
  }
  func.func @transform_4(%arg0: i32, %arg1: i32) -> (i32, i32, i32) {
    %c0_i32 = arith.constant 0 : i32
    %c0_i32_0 = arith.constant 0 : i32
    return %arg0, %arg1, %c0_i32 : i32, i32, i32
  }
  func.func @transform_5(%arg0: i32, %arg1: i32) -> (i32, i32, i32) {
    %c0_i32 = arith.constant 0 : i32
    %c0_i32_0 = arith.constant 0 : i32
    return %arg0, %arg1, %c0_i32 : i32, i32, i32
  }
}

</mosaic_0001>

<bundles_post_ra>
// kernel: encoder_forward.1
= control target key start
LH: loop header
LB: loop body
LE: loop exit
PB: predicated region body
PF: predicated region fallthrough
CT: control target
= control target key end

     0   :  { %s4803_s18 = smov 0   ;;  %s4805_s19 = smov 0   ;;  %s6643_s0 = inlined_call_operand.vmem [shape: bf16[2,256,36], index: 0, kind: input, shape index: {}]   ;;  %s6644_s1 = inlined_call_operand.vmem [shape: f32[2,256,1], index: 1, kind: input, shape index: {}]   ;;  %s6645_s2 = inlined_call_operand.vmem [shape: bf16[36,128], index: 2, kind: input, shape index: {}]   ;;  %s6646_s3 = inlined_call_operand.vmem [shape: f32[1,128], index: 3, kind: input, shape index: {}]   ;;  %s6647_s4 = inlined_call_operand.vmem [shape: f32[2,64,128], index: 4, kind: output, shape index: {0}]   ;;  %s6648_s5 = inlined_call_operand.vmem [shape: f32[2,64,128], index: 5, kind: output, shape index: {1}]  }
   0x1   :  { %s4807_s20 = smov 0  }
   0x2 LB: > { %s28_s21 = sadd.s32 1, %s4763_s19  ;;  %p4348_p0 = scmp.ge.s32.totalorder %s4767_s20, 1  ;;  %s4767_s20 = sphi %s4807_s20, %s16_s20   ;;  %s4763_s19 = sphi %s4805_s19, %s6772_s19   ;;  %s4759_s18 = sphi %s4803_s18, %s6771_s18  }
   0x3   : > { %p30_p1 = scmp.ge.s32.totalorder %s28_s21, 2  ;;  %p230_p2 = scmp.lt.s32.totalorder %s4767_s20, 3 }
   0x5   : > { %s6774_s21 = smov (%p30_p1, %s28_s21), 0  ;;  %p231_p3 = pnand %p4348_p0, %p230_p2 }
   0x7   : > { %234 = sbr.rel (%p231_p3) target bundleno = 436 (0x1b4), region = 36 }
   0xe   : > { %v4662_v0 = vld [vmem:[%s6645_s2] sm:$0xff]   ;;  %v4663_v1 = vld [vmem:[%s6645_s2 + $0x8] sm:$0xff]   ;;  %p285_p4 = scmp.lt.s32.totalorder %s4759_s18, 1  ;;  %v4664_v2 = vld [vmem:[%s6645_s2 + $0x10] ss:$0 sps:$4 sm:$0x33]  }
   0xf   : > { %4546 = vmatprep.subr.bf16.mxu0 %v4662_v0  ;;  %4584 = vmatprep.subr.bf16.mxu1 %v4662_v0  ;;  %vm506_vm0 = vcmask 1041408   ;;  %v6657_v3 = vmov 0   ;;  %vm457_vm1 = vcmask 293888   ;;  %v4770_v14 = vmov 0.0  }
  0x10   : > { %4547 = vmatpush3.bf16.msra.mxu0 %v4662_v0  ;;  %4587 = vmatpush3.bf16.msra.mxu1 %v4662_v0  ;;  %s6776_s18 = smov (!%p285_p4, %s4759_s18), 1  ;;  %v508_v5 = vsel %vm506_vm0, %v4664_v2, 0 }
  0x11   : > { %4548 = vmatprep.subr.bf16.mxu0 %v4663_v1  ;;  %4585 = vmatprep.subr.bf16.mxu1 %v4663_v1  ;;  %s4523_s28 = sshll.u32 %s6776_s18, 7  ;;  %s4524_s29 = sshll.u32 %s6776_s18, 8 }
  0x12   : > { %4621 = vset.pattern.permute.xlu1 %v6657_v3  ;;  %4620 = vset.pattern.permute.xlu0 %v6657_v3  ;;  %s4839_s7 = scalar_lea.vmem %s6643_s0, %s4523_s28  ;;  %s4846_s10 = scalar_lea.vmem %s6644_s1, %s4524_s29 }
  0x13   : > { %v4665_v4 = vld [vmem:[%s4839_s7] sm:$0xff]   ;;  %v4667_v7 = vld [vmem:[%s4839_s7 + $0x8] sm:$0xff]   ;;  %v673_v9 = vld [vmem:[%s4846_s10 + $0x10] sm:$0xff]  ;;  %s4525_s13 = sshll.u32 %s6776_s18, 6 }
  0x14   : > { %4549 = vmatpush3.bf16.msra.mxu0 %v4663_v1  ;;  %4588 = vmatpush3.bf16.msra.mxu1 %v4663_v1  ;;  %v4666_v6 = vld [vmem:[%s4839_s7 + $0x40] sm:$0xff]   ;;  %v4668_v8 = vld [vmem:[%s4839_s7 + $0x48] sm:$0xff]   ;;  %vm705_vm2 = vcmp.gt.f32.partialorder %v673_v9, 0.0  ;;  %v4669_v11 = vld [vmem:[%s4839_s7 + $0x10] sm:$0xff]   ;;  %s5884_s16 = scalar_lea.vmem %s6647_s4, %s4525_s13  ;;  %s6397_s23 = scalar_lea.vmem %s6648_s5, %s4525_s13 }
  0x15   : > { %4590 = vmatprep.subr.msk.bf16.mxu0 %vm506_vm0, %v4664_v2  ;;  %4591 = vmatprep.subr.msk.bf16.mxu1 %vm506_vm0, %v4664_v2  ;;  %v671_v10 = vld [vmem:[%s4846_s10] sm:$0xff]  ;;  %v4670_v12 = vld [vmem:[%s4839_s7 + $0x50] sm:$0xff]   ;;  %v737_v13 = vsel %vm705_vm2, %v673_v9, 1.0  ;;  %v1352_v15 = vsel %vm705_vm2, 1.0, %v4770_v14  ;;  %v4671_v20 = vld [vmem:[%s4839_s7 + $0x18] sm:$0xff]   ;;  %v4875_v24 = vsel %vm705_vm2, 1, %v6657_v3 }
  0x16   : > { %4552 = vmatprep.mubr.msk.bf16.mxu0 %vm457_vm1, %v4665_v4  ;;  %4568 = vmatprep.mubr.msk.bf16.mxu1 %vm457_vm1, %v4666_v6  ;;  %vm703_vm3 = vcmp.gt.f32.partialorder %v671_v10, 0.0  ;;  %4681 = vrcp.f32 %v737_v13  ;;  %v4672_v21 = vld [vmem:[%s4839_s7 + $0x58] sm:$0xff]   ;;  %v672_v23 = vld [vmem:[%s4846_s10 + $0x8] sm:$0xff]  ;;  %v675_v26 = vld [vmem:[%s4846_s10 + $0x20] sm:$0xff] }
  0x17   : > { %v735_v16 = vsel %vm703_vm3, %v671_v10, 1.0  ;;  %v1350_v17 = vsel %vm703_vm3, 1.0, %v4770_v14  ;;  %v4867_v19 = vsel %vm703_vm3, 1, %v6657_v3  ;;  %v674_v22 = vld [vmem:[%s4846_s10 + $0x18] sm:$0xff]  ;;  %vm704_vm5 = vcmp.gt.f32.partialorder %v672_v23, 0.0  ;;  %v676_v25 = vld [vmem:[%s4846_s10 + $0x28] sm:$0xff] }
  0x18   : > { %4551 = vmatpush3.bf16.msra.mxu0 %v508_v5  ;;  %4589 = vmatpush3.bf16.msra.mxu1 %v508_v5  ;;  %v4862_v18 = vmax.f32 %v1350_v17, %v1352_v15  ;;  %4683 = vrcp.f32 %v735_v16  ;;  %vm706_vm4 = vcmp.gt.f32.partialorder %v674_v22, 0.0  ;;  %v736_v29 = vsel %vm704_vm5, %v672_v23, 1.0  ;;  %v4673_v32 = vld [vmem:[%s4839_s7 + $0x20] sm:$0xff]   ;;  %v678_v38 = vld [vmem:[%s4846_s10 + $0x38] sm:$0xff]  ;;  %v677_v40 = vld [vmem:[%s4846_s10 + $0x30] sm:$0xff] }
  0x19   : > { %v738_v27 = vsel %vm706_vm4, %v674_v22, 1.0  ;;  %v1353_v28 = vsel %vm706_vm4, 1.0, %v4770_v14  ;;  %v1351_v30 = vsel %vm704_vm5, 1.0, %v4770_v14  ;;  %vm708_vm6 = vcmp.gt.f32.partialorder %v676_v25, 0.0  ;;  %v4674_v33 = vld [vmem:[%s4839_s7 + $0x60] sm:$0xff]   ;;  %v4906_v41 = vld [vmem:[%s4846_s10 + $0x48] sm:$0xff] }
  0x1a   : > { %4685 = vrcp.f32 %v738_v27  ;;  %v4885_v31 = vmax.f32 %v1351_v30, %v1353_v28  ;;  %vm707_vm7 = vcmp.gt.f32.partialorder %v675_v26, 0.0  ;;  %v740_v34 = vsel %vm708_vm6, %v676_v25, 1.0  ;;  %v4909_v42 = vld [vmem:[%s4846_s10 + $0x40] sm:$0xff]  ;;  %v4675_v50 = vld [vmem:[%s4839_s7 + $0x28] sm:$0xff]   ;;  %v4677_v57 = vld [vmem:[%s4839_s7 + $0x30] sm:$0xff]  }
  0x1b   : > { %4553 = vmatmul.mubr.msk.bf16.vlgmr.msra.gmra.mrb[0].mxu0 %vm457_vm1, %v4667_v7  ;;  %4569 = vmatmul.mubr.msk.bf16.vlgmr.msra.gmra.mrb[0].mxu1 %vm457_vm1, %v4668_v8  ;;  %4687 = vrcp.f32 %v736_v29  ;;  %v739_v35 = vsel %vm707_vm7, %v675_v26, 1.0  ;;  %v1355_v36 = vsel %vm708_vm6, 1.0, %v4770_v14  ;;  %v1354_v37 = vsel %vm707_vm7, 1.0, %v4770_v14  ;;  %v4676_v51 = vld [vmem:[%s4839_s7 + $0x68] sm:$0xff]   ;;  %v4678_v59 = vld [vmem:[%s4839_s7 + $0x70] sm:$0xff]   ;;  %v4945_v63 = vld [vmem:[%s4846_s10 + $0x58] sm:$0xff] }
  0x1c   : > { %4556 = vmatprep.mubr.msk.bf16.mxu0 %vm457_vm1, %v4669_v11  ;;  %4572 = vmatprep.mubr.msk.bf16.mxu1 %vm457_vm1, %v4670_v12  ;;  %4689 = vrcp.f32 %v740_v34  ;;  %v4900_v39 = vsel %vm704_vm5, 1, %v6657_v3  ;;  %vm710_vm8 = vcmp.gt.f32.partialorder %v678_v38, 0.0  ;;  %v4913_v43 = vsel %vm706_vm4, 1, %v6657_v3  ;;  %v4962_v6 = vld [vmem:[%s4846_s10 + $0x50] sm:$0xff]  ;;  %v4965_v7 = vld [vmem:[%s4846_s10 + $0x68] sm:$0xff]  ;;  %v4981_v13 = vld [vmem:[%s4846_s10 + $0x60] sm:$0xff] }
  0x1d   : > { %4691 = vrcp.f32 %v739_v35  ;;  %v4917_v44 = vsel %vm708_vm6, 1, %v6657_v3  ;;  %v742_v46 = vsel %vm710_vm8, %v678_v38, 1.0  ;;  %v1357_v47 = vsel %vm710_vm8, 1.0, %v4770_v14  ;;  %v4679_v25 = vld [vmem:[%s4839_s7 + $0x38] sm:$0xff]   ;;  %v5007_v30 = vld [vmem:[%s4846_s10 + $0x70] sm:$0xff]  ;;  %v5017_v35 = vld [vmem:[%s4846_s10 + $0x88] sm:$0xff] }
  0x1e   : > { %vm709_vm9 = vcmp.gt.f32.partialorder %v677_v40, 0.0  ;;  %vm712_vm10 = vcmp.gt.f32.partialorder %v4906_v41, 0.0  ;;  %4693 = vrcp.f32 %v742_v46  ;;  %v4925_v52 = vmax.f32 %v1355_v36, %v1357_v47  ;;  %v4680_v26 = vld [vmem:[%s4839_s7 + $0x78] sm:$0xff]  }
  0x1f   : > { %v741_v53 = vsel %vm709_vm9, %v677_v40, 1.0  ;;  %v1356_v55 = vsel %vm709_vm9, 1.0, %v4770_v14  ;;  %v744_v56 = vsel %vm712_vm10, %v4906_v41, 1.0  ;;  %vm711_vm11 = vcmp.gt.f32.partialorder %v4909_v42, 0.0 }
  0x20   : > { %v4682_v45 = vpop.eup %4681  ;;  %6671 = vst [vmem:[#allocation2_spill] sm:$0xff] %v4925_v52  ;;  %4695 = vrcp.f32 %v741_v53  ;;  %v4934_v58 = vmax.f32 %v1354_v37, %v1356_v55  ;;  %v743_v60 = vsel %vm711_vm11, %v4909_v42, 1.0  ;;  %v1359_v62 = vsel %vm712_vm10, 1.0, %v4770_v14 }
  0x21   : > { %v772_v49 = vmul.f32 36.0, %v4682_v45  ;;  %4697 = vrcp.f32 %v744_v56  ;;  %v4949_v0 = vsel %vm707_vm7, 1, %v6657_v3  ;;  %v4953_v1 = vsel %vm710_vm8, 1, %v6657_v3 }
  0x22   : > { %v4684_v48 = vpop.eup %4683  ;;  %6672 = vst [vmem:[#allocation3_spill] sm:$0xff] %v4934_v58  ;;  %4699 = vrcp.f32 %v743_v60  ;;  %v1358_v5 = vsel %vm711_vm11, 1.0, %v4770_v14  ;;  %vm714_vm12 = vcmp.gt.f32.partialorder %v4945_v63, 0.0  ;;  %v4969_v8 = vsel %vm709_vm9, 1, %v6657_v3  ;;  %v5055_v60 = vld [vmem:[%s4846_s10 + $0xa8] sm:$0xff] }
  0x23   : > { %4557 = vmatmul.mubr.msk.bf16.gmra.mrb[4].mxu0 %vm457_vm1, %v4671_v20  ;;  %4573 = vmatmul.mubr.msk.bf16.gmra.mrb[4].mxu1 %vm457_vm1, %v4672_v21  ;;  %v768_v54 = vmul.f32 36.0, %v4684_v48  ;;  %v746_v11 = vsel %vm714_vm12, %v4945_v63, 1.0  ;;  %v1361_v12 = vsel %vm714_vm12, 1.0, %v4770_v14  ;;  %vm713_vm13 = vcmp.gt.f32.partialorder %v4962_v6, 0.0  ;;  %v4989_v21 = vld [vmem:[%s4846_s10 + $0x78] sm:$0xff]  ;;  %v5029_v48 = vld [vmem:[%s4846_s10 + $0x80] sm:$0xff] }
  0x24   : > { %4560 = vmatprep.mubr.msk.bf16.mxu0 %vm457_vm1, %v4673_v32  ;;  %4576 = vmatprep.mubr.msk.bf16.mxu1 %vm457_vm1, %v4674_v33  ;;  %v4686_v61 = vpop.eup %4685  ;;  %4701 = vrcp.f32 %v746_v11  ;;  %v4983_v17 = vmax.f32 %v1359_v62, %v1361_v12  ;;  %v745_v20 = vsel %vm713_vm13, %v4962_v6, 1.0  ;;  %v1360_v23 = vsel %vm713_vm13, 1.0, %v4770_v14  ;;  %v5076_v11 = vld [vmem:[%s4846_s10 + $0xa0] sm:$0xff] }
  0x25   : > { %843 = vperm.xlu1 %4621, %v772_v49   ;;  %833 = vperm.xlu0 %4620, %v768_v54   ;;  %v4688_v2 = vpop.eup %4687  ;;  %v774_v4 = vmul.f32 36.0, %v4686_v61  ;;  %4703 = vrcp.f32 %v745_v20  ;;  %vm716_vm14 = vcmp.gt.f32.partialorder %v4965_v7, 0.0  ;;  %v4997_v27 = vmax.f32 %v1358_v5, %v1360_v23  ;;  %v5032_v49 = vld [vmem:[%s4846_s10 + $0x98] sm:$0xff] }
  0x26   : > { %v4690_v9 = vpop.eup %4689  ;;  %v770_v10 = vmul.f32 36.0, %v4688_v2  ;;  %v748_v28 = vsel %vm716_vm14, %v4965_v7, 1.0  ;;  %v1363_v29 = vsel %vm716_vm14, 1.0, %v4770_v14  ;;  %vm715_vm15 = vcmp.gt.f32.partialorder %v4981_v13, 0.0  ;;  %v5085_v20 = vld [vmem:[%s4846_s10 + $0xb8] sm:$0xff] }
  0x27   : > { %v4692_v15 = vpop.eup %4691  ;;  %v778_v16 = vmul.f32 36.0, %v4690_v9  ;;  %4705 = vrcp.f32 %v748_v28  ;;  %v747_v33 = vsel %vm715_vm15, %v4981_v13, 1.0  ;;  %v1362_v34 = vsel %vm715_vm15, 1.0, %v4770_v14 }
  0x28   : > { %v776_v22 = vmul.f32 36.0, %v4692_v15  ;;  %v4694_v32 = vpop.eup %4693  ;;  %vm718_vm0 = vcmp.gt.f32.partialorder %v4989_v21, 0.0  ;;  %4707 = vrcp.f32 %v747_v33  ;;  %vm717_vm2 = vcmp.gt.f32.partialorder %v5007_v30, 0.0 }
  0x29   : > { %848 = vperm.xlu1 %4621, %v774_v4   ;;  %838 = vperm.xlu0 %4620, %v770_v10   ;;  %v782_v37 = vmul.f32 36.0, %v4694_v32  ;;  %v750_v38 = vsel %vm718_vm0, %v4989_v21, 1.0  ;;  %v1365_v40 = vsel %vm718_vm0, 1.0, %v4770_v14  ;;  %vm720_vm3 = vcmp.gt.f32.partialorder %v5017_v35, 0.0  ;;  %v5097_v32 = vld [vmem:[%s4846_s10 + $0xb0] sm:$0xff] }
  0x2a   : > { %v4696_v36 = vpop.eup %4695  ;;  %v5025_v47 = vmax.f32 %v1363_v29, %v1365_v40  ;;  %4709 = vrcp.f32 %v750_v38  ;;  %v752_v56 = vsel %vm720_vm3, %v5017_v35, 1.0  ;;  %vm722_vm4 = vcmp.gt.f32.partialorder %v5032_v49, 0.0  ;;  %v5110_v38 = vld [vmem:[%s4846_s10 + $0xc0] sm:$0xff] }
  0x2b   : > { %4561 = vmatmul.mubr.msk.bf16.gmra.mrb[8].mxu0 %vm457_vm1, %v4675_v50  ;;  %4577 = vmatmul.mubr.msk.bf16.gmra.mrb[8].mxu1 %vm457_vm1, %v4676_v51  ;;  %v4698_v45 = vpop.eup %4697  ;;  %v780_v46 = vmul.f32 36.0, %v4696_v36  ;;  %v749_v50 = vsel %vm717_vm2, %v5007_v30, 1.0  ;;  %v1364_v51 = vsel %vm717_vm2, 1.0, %v4770_v14  ;;  %v1369_v4 = vsel %vm722_vm4, 1.0, %v4770_v14  ;;  %v5104_v36 = vld [vmem:[%s4846_s10 + $0xc8] sm:$0xff] }
  0x2c   : > { %4564 = vmatprep.mubr.msk.bf16.mxu0 %vm457_vm1, %v4677_v57  ;;  %4580 = vmatprep.mubr.msk.bf16.mxu1 %vm457_vm1, %v4678_v59  ;;  %6673 = vst [vmem:[#allocation4_spill] sm:$0xff] %v5025_v47  ;;  %v4700_v53 = vpop.eup %4699  ;;  %v786_v54 = vmul.f32 36.0, %v4698_v45  ;;  %v5043_v55 = vmax.f32 %v1362_v34, %v1364_v51  ;;  %v1367_v57 = vsel %vm720_vm3, 1.0, %v4770_v14  ;;  %v5052_v59 = vld [vmem:[%s4846_s10 + $0x90] sm:$0xff]  ;;  %4711 = vrcp.f32 %v749_v50 }
  0x2d   : > { %858 = vperm.xlu1 %4621, %v778_v16   ;;  %853 = vperm.xlu0 %4620, %v776_v22   ;;  %v784_v61 = vmul.f32 36.0, %v4700_v53  ;;  %4713 = vrcp.f32 %v752_v56  ;;  %v754_v9 = vsel %vm722_vm4, %v5032_v49, 1.0  ;;  %v5071_v10 = vmax.f32 %v1367_v57, %v1369_v4  ;;  %v5126_v56 = vld [vmem:[%s4846_s10 + $0xd8] sm:$0xff] }
  0x2e   : > { %6674 = vst [vmem:[#allocation5_spill] sm:$0xff] %v5043_v55  ;;  %v4702_v5 = vpop.eup %4701  ;;  %vm6654_vm5 = vcmp.gt.f32.partialorder %v5052_v59, 0.0  ;;  %vm6649_vm6 = vcmp.gt.f32.partialorder %v5055_v60, 0.0  ;;  %vm6650_vm7 = vcmp.gt.f32.partialorder %v5076_v11, 0.0  ;;  %vm6651_vm8 = vcmp.gt.f32.partialorder %v5085_v20, 0.0 }
  0x2f   : > { %v4704_v12 = vpop.eup %4703  ;;  %v753_v15 = vsel %vm6654_vm5, %v5052_v59, 1.0  ;;  %v1368_v16 = vsel %vm6654_vm5, 1.0, %v4770_v14  ;;  %v790_v22 = vmul.f32 36.0, %v4702_v5  ;;  %v1371_v29 = vsel %vm6649_vm6, 1.0, %v4770_v14 }
  0x30   : > { %v788_v28 = vmul.f32 36.0, %v4704_v12  ;;  %v1370_v34 = vsel %vm6650_vm7, 1.0, %v4770_v14  ;;  %vm6652_vm9 = vcmp.gt.f32.partialorder %v5097_v32, 0.0  ;;  %v758_v53 = vsel %vm6651_vm8, %v5085_v20, 1.0 }
  0x31   : > { %868 = vperm.xlu1 %4621, %v782_v37   ;;  %863 = vperm.xlu0 %4620, %v780_v46   ;;  %v1373_v37 = vsel %vm6651_vm8, 1.0, %v4770_v14  ;;  %v755_v46 = vsel %vm6650_vm7, %v5076_v11, 1.0  ;;  %vm727_vm7 = vcmp.gt.f32.partialorder %v5110_v38, 0.0  ;;  %v757_v5 = vsel %vm6652_vm9, %v5097_v32, 1.0 }
  0x32   : > { %v5115_v50 = vmax.f32 %v1371_v29, %v1373_v37  ;;  %vm6655_vm8 = vcmp.gt.f32.partialorder %v5126_v56, 0.0  ;;  %v5163_v37 = vld [vmem:[%s4846_s10 + $0xf8] sm:$0xff] }
  0x33   : > { %4565 = vmatmul.mubr.msk.bf16.gmra.mrb[12].mxu0 %vm457_vm1, %v4679_v25  ;;  %4581 = vmatmul.mubr.msk.bf16.gmra.mrb[12].mxu1 %vm457_vm1, %v4680_v26  ;;  %vm719_vm1 = vcmp.gt.f32.partialorder %v5029_v48, 0.0  ;;  %v756_v25 = vsel %vm6649_vm6, %v5055_v60, 1.0  ;;  %v4706_v26 = vpop.eup %4705  ;;  %vm6653_vm6 = vcmp.gt.f32.partialorder %v5104_v36, 0.0 }
  0x34   : > { %v751_v62 = vsel %vm719_vm1, %v5029_v48, 1.0  ;;  %v1366_v2 = vsel %vm719_vm1, 1.0, %v4770_v14  ;;  %v4708_v33 = vpop.eup %4707  ;;  %v794_v45 = vmul.f32 36.0, %v4706_v26  ;;  %v1377_v26 = vsel %vm6655_vm8, 1.0, %v4770_v14 }
  0x35   : > { %878 = vperm.xlu1 %4621, %v786_v54   ;;  %4715 = vrcp.f32 %v751_v62  ;;  %v5087_v23 = vmax.f32 %v1366_v2, %v1368_v16  ;;  %873 = vperm.xlu0 %4620, %v784_v61   ;;  %v4710_v40 = vpop.eup %4709  ;;  %v792_v51 = vmul.f32 36.0, %v4708_v33  ;;  %v1372_v54 = vsel %vm6652_vm9, 1.0, %v4770_v14  ;;  %v5135_v2 = vld [vmem:[%s4846_s10 + $0xd0] sm:$0xff] }
  0x36   : > { %4717 = vrcp.f32 %v754_v9  ;;  %v4712_v57 = vpop.eup %4711  ;;  %v5128_v61 = vmax.f32 %v1370_v34, %v1372_v54  ;;  %v1375_v62 = vsel %vm6653_vm6, 1.0, %v4770_v14  ;;  %v1374_v9 = vsel %vm727_vm7, 1.0, %v4770_v14 }
  0x37   : > { %4719 = vrcp.f32 %v753_v15  ;;  %v4714_v4 = vpop.eup %4713  ;;  %v798_v12 = vmul.f32 36.0, %v4710_v40  ;;  %v5145_v15 = vld [vmem:[%s4846_s10 + $0xe8] sm:$0xff]  ;;  %vm6656_vm9 = vcmp.gt.f32.partialorder %v5135_v2, 0.0  ;;  %v5157_v33 = vmax.f32 %v1375_v62, %v1377_v26 }
  0x38   : > { %4721 = vrcp.f32 %v756_v25  ;;  %v760_v25 = vsel %vm6653_vm6, %v5104_v36, 1.0  ;;  %v1376_v34 = vsel %vm6656_vm9, 1.0, %v4770_v14  ;;  %v4771_v40 = vmov 1983009808  }
  0x39   : > { %888 = vperm.xlu1 %4621, %v790_v22   ;;  %883 = vperm.xlu0 %4620, %v788_v28   ;;  %4723 = vrcp.f32 %v755_v46  ;;  %v796_v22 = vmul.f32 36.0, %v4712_v57  ;;  %v5155_v28 = vld [vmem:[%s4846_s10 + $0xe0] sm:$0xff]  ;;  %v5170_v54 = vmax.f32 %v1374_v9, %v1376_v34  ;;  %vm732_vm6 = vcmp.gt.f32.partialorder %v5145_v15, 0.0 }
  0x3a   : > { %4725 = vrcp.f32 %v758_v53  ;;  %v759_v53 = vsel %vm727_vm7, %v5110_v38, 1.0  ;;  %v762_v62 = vsel %vm6655_vm8, %v5126_v56, 1.0  ;;  %vm731_vm5 = vcmp.gt.f32.partialorder %v5155_v28, 0.0 }
  0x3b   : > { %4727 = vrcp.f32 %v757_v5  ;;  %v1379_v5 = vsel %vm732_vm6, 1.0, %v4770_v14  ;;  %vm734_vm8 = vcmp.gt.f32.partialorder %v5163_v37, 0.0  ;;  %v764_v3 = vsel %vm732_vm6, %v5145_v15, 1.0 }
  0x3c   : > { %4729 = vrcp.f32 %v760_v25  ;;  %v1378_v25 = vsel %vm731_vm5, 1.0, %v4770_v14  ;;  %v763_v6 = vsel %vm731_vm5, %v5155_v28, 1.0  ;;  %v6687_v28 = vlaneseq }
  0x3d   : > { %898 = vperm.xlu1 %4621, %v794_v45   ;;  %893 = vperm.xlu0 %4620, %v792_v51   ;;  %v5165_v45 = vunpack.c.l.s4 %v4771_v40  ;;  %v802_v51 = vmul.f32 36.0, %v4714_v4  ;;  %v5181_v4 = vld [vmem:[%s4846_s10 + $0xf0] sm:$0xff]  ;;  %4731 = vrcp.f32 %v759_v53  ;;  %v1381_v40 = vsel %vm734_vm8, 1.0, %v4770_v14 }
  0x3e   : > { %4733 = vrcp.f32 %v762_v62  ;;  %v6675_v53 = vmov 0  }
  0x3f   : > { %v4716_v29 = vpop.eup %4715  ;;  %v1417_v16 = vunpack.c.0.s8 %v5165_v45  ;;  %v5206_v45 = vsel %vm712_vm10, 1, %v6675_v53  ;;  %v5233_v42 = vsel %vm715_vm15, 1, %v6675_v53  ;;  %v5238_v63 = vsel %vm718_vm0, 1, %v6675_v53 }
  0x40   : > { %v4718_v46 = vpop.eup %4717  ;;  %v800_v9 = vmul.f32 36.0, %v4716_v29  ;;  %v5194_v29 = vmax.f32 %v1379_v5, %v1381_v40  ;;  %v5218_v5 = vsel %vm714_vm12, 1, %v6675_v53  ;;  %v5246_v7 = vsel %vm717_vm2, 1, %v6675_v53 }
  0x41   : > { %v4720_v57 = vpop.eup %4719  ;;  %908 = vperm.xlu1 %4621, %v798_v12   ;;  %903 = vperm.xlu0 %4620, %v796_v22   ;;  %v761_v12 = vsel %vm6656_vm9, %v5135_v2, 1.0  ;;  %v806_v34 = vmul.f32 36.0, %v4718_v46  ;;  %vm733_vm9 = vcmp.gt.f32.partialorder %v5181_v4, 0.0  ;;  %v5251_v13 = vsel %vm720_vm3, 1, %v6675_v53 }
  0x42   : > { %v4722_v26 = vpop.eup %4721  ;;  %v804_v22 = vmul.f32 36.0, %v4720_v57  ;;  %4735 = vrcp.f32 %v761_v12  ;;  %v1380_v46 = vsel %vm733_vm9, 1.0, %v4770_v14  ;;  %v5223_v14 = vsel %vm713_vm13, 1, %v6675_v53 }
  0x43   : > { %v4724_v57 = vpop.eup %4723  ;;  %v5208_v62 = vmax.f32 %v1378_v25, %v1380_v46  ;;  %v810_v12 = vmul.f32 36.0, %v4722_v26  ;;  %v5256_v21 = vsel %vm719_vm1, 1, %v6675_v53  ;;  %v5261_v25 = vsel %vm722_vm4, 1, %v6675_v53 }
  0x44   : > { %v4726_v41 = vpop.eup %4725  ;;  %vm6676_vm10 = vcmp.gt.f32.partialorder %v5052_v59, 0.0  ;;  %vm6678_vm12 = vcmp.gt.f32.partialorder %v5076_v11, 0.0  ;;  %vm6679_vm13 = vcmp.gt.f32.partialorder %v5085_v20, 0.0  ;;  %vm6681_vm15 = vcmp.gt.f32.partialorder %v5104_v36, 0.0 }
  0x45   : > { %918 = vperm.xlu1 %4621, %v802_v51   ;;  %913 = vperm.xlu0 %4620, %v800_v9   ;;  %v5213_v51 = vsel %vm711_vm11, 1, %v6675_v53  ;;  %v5228_v9 = vsel %vm716_vm14, 1, %v6675_v53  ;;  %v4728_v26 = vpop.eup %4727  ;;  %v5266_v30 = vsel %vm6676_vm10, 1, %v6675_v53  ;;  %vm6677_vm11 = vcmp.gt.f32.partialorder %v5055_v60, 0.0 }
  0x46   : > { %v5271_v35 = vsel %vm6677_vm11, 1, %v6675_v53  ;;  %v5276_v48 = vsel %vm6678_vm12, 1, %v6675_v53  ;;  %v5281_v49 = vsel %vm6679_vm13, 1, %v6675_v53  ;;  %vm6680_vm14 = vcmp.gt.f32.partialorder %v5097_v32, 0.0  ;;  %v4730_v11 = vpop.eup %4729 }
  0x47   : > { %v5286_v59 = vsel %vm6680_vm14, 1, %v6675_v53  ;;  %v5291_v60 = vsel %vm6681_vm15, 1, %v6675_v53  ;;  %4737 = vrcp.f32 %v764_v3  ;;  %v5296_v40 = vsel %vm727_vm7, 1, %v6675_v53 }
  0x48   : > { %vm6682_vm0 = vcmp.gt.f32.partialorder %v5126_v56, 0.0  ;;  %vm6683_vm2 = vcmp.gt.f32.partialorder %v5135_v2, 0.0  ;;  %4739 = vrcp.f32 %v763_v6  ;;  %v5311_v3 = vsel %vm732_vm6, 1, %v6675_v53  ;;  %v4732_v56 = vpop.eup %4731 }
  0x49   : > { %928 = vperm.xlu1 %4621, %v806_v34   ;;  %923 = vperm.xlu0 %4620, %v804_v22   ;;  %v808_v34 = vmul.f32 36.0, %v4724_v57  ;;  %v5301_v20 = vsel %vm6682_vm0, 1, %v6675_v53  ;;  %v5306_v32 = vsel %vm6683_vm2, 1, %v6675_v53  ;;  %v5316_v36 = vsel %vm731_vm5, 1, %v6675_v53  ;;  %v4734_v57 = vpop.eup %4733 }
  0x4a   : > { %6684 = vst [vmem:[#allocation6_spill] sm:$0xff] %v5316_v36  ;;  %v5321_v38 = vsel %vm734_vm8, 1, %v6675_v53  ;;  %v814_v2 = vmul.f32 36.0, %v4726_v41  ;;  %v766_v22 = vsel %vm734_vm8, %v5163_v37, 1.0  ;;  %v5329_v15 = vsel %vm733_vm9, 1, %v6675_v53 }
  0x4b   : > { %6685 = vst [vmem:[#allocation7_spill] sm:$0xff] %v5321_v38  ;;  %6686 = vst [vmem:[#allocation8_spill] sm:$0xff] %v5329_v15  ;;  %v5332_v46 = vshrl.u32 %v6687_v28, 7  ;;  %v812_v6 = vmul.f32 36.0, %v4728_v26  ;;  %4741 = vrcp.f32 %v766_v22  ;;  %v818_v37 = vmul.f32 36.0, %v4730_v11 }
  0x4c   : > { %v4736_v41 = vpop.eup %4735  ;;  %v816_v26 = vmul.f32 36.0, %v4732_v56  ;;  %vm2950_vm10 = vcmask 1041409   ;;  %vm2952_vm12 = vcmask 1042434   ;;  %vm2954_vm14 = vcmask 1043459  }
  0x4d   : > { %938 = vperm.xlu1 %4621, %v810_v12   ;;  %6688 = vst [vmem:[#allocation9_spill] sm:$0xff] %v5332_v46  ;;  %933 = vperm.xlu0 %4620, %v808_v34   ;;  %v765_v12 = vsel %vm733_vm9, %v5181_v4, 1.0  ;;  %v5338_v38 = vsub.s32 %v1417_v16, %v5332_v46  ;;  %vm2956_vm2 = vcmask 1044484  }
  0x4e   : > { %4743 = vrcp.f32 %v765_v12  ;;  %v822_v12 = vmul.f32 36.0, %v4734_v57 }
  0x4f   : > { %v5342_v53 = vrot.slane %v4862_v18, %v5338_v38  ;;  %v5346_v34 = vrot.slane %v4885_v31, %v5338_v38  ;;  %v5350_v4 = vrot.slane %v4934_v58, %v5338_v38  ;;  %v5354_v16 = vrot.slane %v4925_v52, %v5338_v38 }
  0x50   : > { %v820_v58 = vmul.f32 36.0, %v4736_v41 }
  0x51   : > { %948 = vperm.xlu1 %4621, %v814_v2   ;;  %6689 = vst [vmem:[#allocation10_spill] sm:$0xff] %v5346_v34  ;;  %943 = vperm.xlu0 %4620, %v812_v6   ;;  %v4457_v11 = vrot.slane %v5342_v53, 9  ;;  %v4461_v2 = vrot.slane %v5346_v34, 9  ;;  %v4465_v22 = vrot.slane %v5350_v4, 9  ;;  %v4738_v28 = vpop.eup %4737  ;;  %v4469_v52 = vrot.slane %v5354_v16, 9 }
  0x52   : > { %v4740_v46 = vpop.eup %4739  ;;  %v826_v57 = vmul.f32 36.0, %v4738_v28 }
  0x53   : > { %v5360_v6 = vmax.f32 %v5342_v53, %v4457_v11  ;;  %v5363_v56 = vmax.f32 %v5346_v34, %v4461_v2  ;;  %v5369_v36 = vmax.f32 %v5350_v4, %v4465_v22  ;;  %v824_v2 = vmul.f32 36.0, %v4740_v46 }
  0x54   : > { %v5378_v34 = vrot.slane %v4997_v27, %v5338_v38  ;;  %v5382_v22 = vrot.slane %v4983_v17, %v5338_v38  ;;  %v5388_v46 = vrot.slane %v5043_v55, %v5338_v38 }
  0x55   : > { %958 = vperm.xlu1 %4621, %v818_v37   ;;  %953 = vperm.xlu0 %4620, %v816_v26   ;;  %v5372_v37 = vmax.f32 %v5354_v16, %v4469_v52  ;;  %v4742_v11 = vpop.eup %4741  ;;  %v5392_v26 = vrot.slane %v5025_v47, %v5338_v38 }
  0x56   : > { %v830_v52 = vmul.f32 36.0, %v4742_v11  ;;  %v4473_v28 = vrot.slane %v5378_v34, 9  ;;  %v4481_v11 = vrot.slane %v5388_v46, 9 }
  0x58   : > { %v4744_v41 = vpop.eup %4743  ;;  %v5395_v15 = vmax.f32 %v5378_v34, %v4473_v28  ;;  %v5405_v55 = vmax.f32 %v5388_v46, %v4481_v11  ;;  %v5422_v28 = vrot.slane %v5071_v10, %v5338_v38 }
  0x59   : > { %968 = vperm.xlu1 %4621, %v822_v12   ;;  %963 = vperm.xlu0 %4620, %v820_v58   ;;  %v828_v12 = vmul.f32 36.0, %v4744_v41  ;;  %v4477_v58 = vrot.slane %v5382_v22, 9  ;;  %v4485_v41 = vrot.slane %v5392_v26, 9 }
  0x5b   : > { %v5408_v47 = vmax.f32 %v5392_v26, %v4485_v41 }
  0x5d   : > { %978 = vperm.xlu1 %4621, %v826_v57   ;;  %973 = vperm.xlu0 %4620, %v824_v2   ;;  %v5398_v57 = vmax.f32 %v5382_v22, %v4477_v58  ;;  %v5462_v2 = vrot.slane %v5208_v62, %v5338_v38 }
  0x61   : > { %988 = vperm.xlu1 %4621, %v830_v52   ;;  %983 = vperm.xlu0 %4620, %v828_v12   ;;  %v5416_v12 = vrot.slane %v5087_v23, %v5338_v38 }
  0x63   : > { %v4489_v58 = vrot.slane %v5416_v12, 9 }
  0x65   : > { %1098 = vperm.xlu1 %4621, %v4900_v39   ;;  %1095 = vperm.xlu0 %4620, %v4867_v19   ;;  %v5427_v19 = vrot.slane %v5128_v61, %v5338_v38  ;;  %v4493_v39 = vrot.slane %v5422_v28, 9  ;;  %v5431_v11 = vmax.f32 %v5416_v12, %v4489_v58 }
  0x67   : > { %v5441_v41 = vmax.f32 %v5422_v28, %v4493_v39 }
  0x69   : > { %1104 = vperm.xlu1 %4621, %v4913_v43   ;;  %1101 = vperm.xlu0 %4620, %v4875_v24   ;;  %v5436_v24 = vrot.slane %v5115_v50, %v5338_v38  ;;  %v4497_v43 = vrot.slane %v5427_v19, 9 }
  0x6b   : > { %v4501_v52 = vrot.slane %v5436_v24, 9  ;;  %v5447_v58 = vmax.f32 %v5427_v19, %v4497_v43 }
  0x6d   : > { %1110 = vperm.xlu1 %4621, %v4917_v44   ;;  %1107 = vperm.xlu0 %4620, %v4949_v0   ;;  %v5451_v44 = vmax.f32 %v5436_v24, %v4501_v52  ;;  %v5456_v0 = vrot.slane %v5170_v54, %v5338_v38 }
  0x6f   : > { %v4505_v43 = vrot.slane %v5456_v0, 9 }
  0x71   : > { %1116 = vperm.xlu1 %4621, %v4953_v1   ;;  %1113 = vperm.xlu0 %4620, %v4969_v8   ;;  %v4513_v1 = vrot.slane %v5462_v2, 9  ;;  %v5469_v8 = vmax.f32 %v5456_v0, %v4505_v43 }
  0x73   : > { %v5472_v52 = vmax.f32 %v5462_v2, %v4513_v1 }
  0x75   : > { %1122 = vperm.xlu1 %4621, %v5206_v45   ;;  %1119 = vperm.xlu0 %4620, %v5213_v51   ;;  %v5486_v45 = vrot.slane %v5157_v33, %v5338_v38  ;;  %v5491_v51 = vrot.slane %v5194_v29, %v5338_v38 }
  0x79   : > { %1128 = vperm.xlu1 %4621, %v5218_v5   ;;  %1125 = vperm.xlu0 %4620, %v5223_v14   ;;  %v4509_v5 = vrot.slane %v5486_v45, 9  ;;  %v4517_v14 = vrot.slane %v5491_v51, 9 }
  0x7d   : > { %1134 = vperm.xlu1 %4621, %v5228_v9   ;;  %1131 = vperm.xlu0 %4620, %v5233_v42   ;;  %v5497_v9 = vmax.f32 %v5486_v45, %v4509_v5  ;;  %v5501_v42 = vmax.f32 %v5491_v51, %v4517_v14  ;;  %v6696_v5 = vld [vmem:[#allocation3_spill] sm:$0xff] }
  0x7e   : > { %v2072_v14 = vcombine.high %v6696_v5, %v6696_v5 }
  0x7f   : > { %6690 = vst [vmem:[#allocation11_spill] sm:$0xff] %v5497_v9  ;;  %6691 = vst [vmem:[#allocation12_spill] sm:$0xff] %v5501_v42 }
  0x81   : > { %1140 = vperm.xlu1 %4621, %v5238_v63   ;;  %1137 = vperm.xlu0 %4620, %v5246_v7   ;;  %v2038_v7 = vcombine.high %v4862_v18, %v4862_v18  ;;  %v2055_v18 = vcombine.high %v4885_v31, %v4885_v31 }
  0x85   : > { %1146 = vperm.xlu1 %4621, %v5251_v13   ;;  %1143 = vperm.xlu0 %4620, %v5256_v21   ;;  %v2053_v13 = vcombine.high %v5342_v53, %v5342_v53  ;;  %v2052_v21 = vrot.slane %v2038_v7, %v5338_v38  ;;  %v6695_v53 = vld [vmem:[#allocation10_spill] sm:$0xff]  ;;  %v6697_v7 = vpack.i.bf16 %v5363_v56, %v5360_v6 }
  0x86   : > { %v2087_v6 = vcombine.high %v5350_v4, %v5350_v4  ;;  %v6700_v4 = vpack.i.bf16 %v5372_v37, %v5369_v36  ;;  %v2121_v36 = vcombine.high %v5378_v34, %v5378_v34 }
  0x89   : > { %1152 = vperm.xlu1 %4621, %v5261_v25   ;;  %1149 = vperm.xlu0 %4620, %v5266_v30   ;;  %v4458_v25 = vrot.slane %v2053_v13, 9  ;;  %v2054_v30 = vcombine.high %v2052_v21, %v2052_v21 }
  0x8d   : > { %1158 = vperm.xlu1 %4621, %v5271_v35   ;;  %1155 = vperm.xlu0 %4620, %v5276_v48   ;;  %v6692_v35 = vld [vmem:[#allocation6_spill] sm:$0xff]  ;;  %v6693_v48 = vld [vmem:[#allocation7_spill] sm:$0xff] }
  0x91   : > { %1164 = vperm.xlu1 %4621, %v5281_v49   ;;  %1161 = vperm.xlu0 %4620, %v5286_v59   ;;  %v2567_v49 = vmax.f32 %v2053_v13, %v4458_v25  ;;  %v4460_v59 = vrot.slane %v2054_v30, 9 }
  0x93   : > { %v2569_v31 = vmax.f32 %v2054_v30, %v4460_v59  ;;  %v6698_v30 = vld [vmem:[#allocation2_spill] sm:$0xff] }
  0x94   : > { %v2089_v59 = vcombine.high %v6698_v30, %v6698_v30 }
  0x95   : > { %1170 = vperm.xlu1 %4621, %v5291_v60   ;;  %1167 = vperm.xlu0 %4620, %v5296_v40   ;;  %v2069_v60 = vrot.slane %v2055_v18, %v5338_v38  ;;  %v6694_v40 = vld [vmem:[#allocation8_spill] sm:$0xff] }
  0x97   : > { %v4463_v1 = vrot.slane %v2069_v60, 9  ;;  %v2071_v18 = vcombine.high %v2069_v60, %v2069_v60 }
  0x99   : > { %1176 = vperm.xlu1 %4621, %v5301_v20   ;;  %1173 = vperm.xlu0 %4620, %v5306_v32   ;;  %v4459_v20 = vrot.slane %v2052_v21, 9  ;;  %v2070_v32 = vcombine.high %v6695_v53, %v6695_v53  ;;  %v4464_v5 = vrot.slane %v2071_v18, 9 }
  0x9b   : > { %v2568_v13 = vmax.f32 %v2052_v21, %v4459_v20  ;;  %v4462_v25 = vrot.slane %v2070_v32, 9 }
  0x9d   : > { %1182 = vperm.xlu1 %4621, %v5311_v3   ;;  %1179 = vperm.xlu0 %4620, %v6692_v35   ;;  %v2571_v53 = vmax.f32 %v2070_v32, %v4462_v25 }
  0xa1   : > { %1188 = vperm.xlu1 %4621, %v6693_v48   ;;  %1185 = vperm.xlu0 %4620, %v6694_v40   ;;  %v2572_v40 = vmax.f32 %v2069_v60, %v4463_v1  ;;  %v2104_v60 = vcombine.high %v5354_v16, %v5354_v16  ;;  %v2573_v1 = vmax.f32 %v2071_v18, %v4464_v5 }
  0xa2   : > { %v2106_v16 = vcombine.high %v4997_v27, %v4997_v27 }
  0xa4   : > { %v5526_v3 = vpop.permute.xlu1 %843  ;;  %v5528_v43 = vpop.permute.xlu0 %833  ;;  %v2120_v37 = vrot.slane %v2106_v16, %v5338_v38 }
  0xa5   : > { %3043 = vperm.xlu1 %4621, %v2567_v49   ;;  %4623 = vperm.xlu0 %4620, %v6697_v7   ;;  %v2086_v49 = vrot.slane %v2072_v14, %v5338_v38  ;;  %v4466_v14 = vrot.slane %v2087_v6, 9 }
  0xa7   : > { %v4467_v20 = vrot.slane %v2086_v49, 9  ;;  %v2088_v7 = vcombine.high %v2086_v49, %v2086_v49 }
  0xa8   : > { %v5535_v35 = vpop.permute.xlu1 %848  ;;  %v5537_v48 = vpop.permute.xlu0 %838 }
  0xa9   : > { %3067 = vperm.xlu1 %4621, %v2569_v31   ;;  %3055 = vperm.xlu0 %4620, %v2568_v13   ;;  %v2103_v31 = vrot.slane %v2089_v59, %v5338_v38  ;;  %v2576_v25 = vmax.f32 %v2086_v49, %v4467_v20  ;;  %v2575_v59 = vmax.f32 %v2087_v6, %v4466_v14 }
  0xaa   : > { %v2122_v14 = vcombine.high %v2120_v37, %v2120_v37 }
  0xab   : > { %v2105_v30 = vcombine.high %v2103_v31, %v2103_v31  ;;  %v4471_v20 = vrot.slane %v2103_v31, 9 }
  0xac   : > { %v5544_v56 = vpop.permute.xlu1 %858  ;;  %v5546_v21 = vpop.permute.xlu0 %853  ;;  %v4476_v16 = vrot.slane %v2122_v14, 9 }
  0xad   : > { %6699 = vst [vmem:[#allocation6_spill] sm:$0xff] %v5544_v56  ;;  %3103 = vperm.xlu1 %4621, %v2572_v40   ;;  %3091 = vperm.xlu0 %4620, %v2571_v53   ;;  %v4470_v40 = vrot.slane %v2104_v60, 9  ;;  %v4468_v53 = vrot.slane %v2088_v7, 9  ;;  %v4472_v39 = vrot.slane %v2105_v30, 9  ;;  %v4772_v56 = vmov 269488144  }
  0xaf   : > { %v2579_v63 = vmax.f32 %v2104_v60, %v4470_v40  ;;  %v2577_v49 = vmax.f32 %v2088_v7, %v4468_v53  ;;  %v2581_v6 = vmax.f32 %v2105_v30, %v4472_v39  ;;  %v2123_v60 = vcombine.high %v4983_v17, %v4983_v17 }
  0xb0   : > { %v5551_v32 = vpop.permute.xlu1 %868  ;;  %v5553_v13 = vpop.permute.xlu0 %863  ;;  %v4475_v53 = vrot.slane %v2120_v37, 9  ;;  %v2138_v39 = vcombine.high %v5382_v22, %v5382_v22  ;;  %v2585_v17 = vmax.f32 %v2122_v14, %v4476_v16  ;;  %v6711_v14 = vld [vmem:[#allocation4_spill] sm:$0xff] }
  0xb1   : > { %4628 = vperm.xlu1 %4621, %v6700_v4   ;;  %3115 = vperm.xlu0 %4620, %v2573_v1   ;;  %v4474_v1 = vrot.slane %v2121_v36, 9  ;;  %v2157_v16 = vcombine.high %v6711_v14, %v6711_v14 }
  0xb3   : > { %v2583_v7 = vmax.f32 %v2121_v36, %v4474_v1  ;;  %v6710_v36 = vpack.i.bf16 %v5398_v57, %v5395_v15  ;;  %v4478_v1 = vrot.slane %v2138_v39, 9  ;;  %v2155_v15 = vcombine.high %v5388_v46, %v5388_v46 }
  0xb4   : > { %v5560_v18 = vpop.permute.xlu1 %878  ;;  %v5562_v5 = vpop.permute.xlu0 %873  ;;  %v6714_v46 = vpack.i.bf16 %v5408_v47, %v5405_v55  ;;  %v2189_v47 = vcombine.high %v5416_v12, %v5416_v12 }
  0xb5   : > { %6701 = vst [vmem:[#allocation7_spill] sm:$0xff] %v5560_v18  ;;  %6702 = vst [vmem:[#allocation8_spill] sm:$0xff] %v5562_v5  ;;  %3151 = vperm.xlu1 %4621, %v2576_v25   ;;  %3139 = vperm.xlu0 %4620, %v2575_v59   ;;  %v2580_v25 = vmax.f32 %v2103_v31, %v4471_v20  ;;  %v2137_v59 = vrot.slane %v2123_v60, %v5338_v38 }
  0xb7   : > { %v4479_v31 = vrot.slane %v2137_v59, 9  ;;  %v2139_v60 = vcombine.high %v2137_v59, %v2137_v59 }
  0xb8   : > { %v5567_v4 = vpop.permute.xlu1 %888  ;;  %v5569_v27 = vpop.permute.xlu0 %883 }
  0xb9   : > { %6703 = vst [vmem:[#allocation10_spill] sm:$0xff] %v5567_v4  ;;  %6704 = vst [vmem:[#allocation3_spill] sm:$0xff] %v5569_v27  ;;  %3187 = vperm.xlu1 %4621, %v2579_v63   ;;  %3163 = vperm.xlu0 %4620, %v2577_v49   ;;  %v6709_v49 = vld [vmem:[#allocation5_spill] sm:$0xff] }
  0xba   : > { %v2140_v20 = vcombine.high %v6709_v49, %v6709_v49  ;;  %v2587_v49 = vmax.f32 %v2138_v39, %v4478_v1 }
  0xbc   : > { %v5573_v40 = vpop.permute.xlu1 %898  ;;  %v5575_v34 = vpop.permute.xlu0 %893 }
  0xbd   : > { %6705 = vst [vmem:[#allocation2_spill] sm:$0xff] %v5573_v40  ;;  %6706 = vst [vmem:[#allocation13_spill] sm:$0xff] %v5575_v34  ;;  %3211 = vperm.xlu1 %4621, %v2581_v6   ;;  %3199 = vperm.xlu0 %4620, %v2580_v25   ;;  %v2584_v6 = vmax.f32 %v2120_v37, %v4475_v53  ;;  %v2588_v40 = vmax.f32 %v2137_v59, %v4479_v31 }
  0xbe   : > { %v2172_v59 = vcombine.high %v5392_v26, %v5392_v26  ;;  %v2174_v26 = vcombine.high %v5087_v23, %v5087_v23  ;;  %v2191_v23 = vcombine.high %v5071_v10, %v5071_v10 }
  0xc0   : > { %v5580_v63 = vpop.permute.xlu1 %908  ;;  %v5582_v30 = vpop.permute.xlu0 %903  ;;  %v2188_v55 = vrot.slane %v2174_v26, %v5338_v38  ;;  %v2205_v26 = vrot.slane %v2191_v23, %v5338_v38 }
  0xc1   : > { %6707 = vst [vmem:[#allocation14_spill] sm:$0xff] %v5580_v63  ;;  %6708 = vst [vmem:[#allocation15_spill] sm:$0xff] %v5582_v30  ;;  %3235 = vperm.xlu1 %4621, %v2583_v7   ;;  %4633 = vperm.xlu0 %4620, %v6710_v36   ;;  %v2154_v7 = vrot.slane %v2140_v20, %v5338_v38  ;;  %v4480_v63 = vrot.slane %v2139_v60, 9  ;;  %v4482_v20 = vrot.slane %v2155_v15, 9 }
  0xc2   : > { %v4495_v23 = vrot.slane %v2205_v26, 9 }
  0xc3   : > { %v4483_v53 = vrot.slane %v2154_v7, 9  ;;  %v2589_v31 = vmax.f32 %v2139_v60, %v4480_v63  ;;  %v2156_v36 = vcombine.high %v2154_v7, %v2154_v7 }
  0xc4   : > { %v5589_v25 = vpop.permute.xlu1 %918  ;;  %v5591_v22 = vpop.permute.xlu0 %913 }
  0xc5   : > { %3259 = vperm.xlu1 %4621, %v2585_v17   ;;  %3247 = vperm.xlu0 %4620, %v2584_v6   ;;  %v2171_v17 = vrot.slane %v2157_v16, %v5338_v38  ;;  %v2592_v1 = vmax.f32 %v2154_v7, %v4483_v53  ;;  %v2591_v16 = vmax.f32 %v2155_v15, %v4482_v20  ;;  %v4490_v20 = vrot.slane %v2189_v47, 9 }
  0xc7   : > { %v2173_v14 = vcombine.high %v2171_v17, %v2171_v17  ;;  %v4487_v53 = vrot.slane %v2171_v17, 9  ;;  %v2599_v10 = vmax.f32 %v2189_v47, %v4490_v20  ;;  %v2257_v20 = vcombine.high %v5456_v0, %v5456_v0 }
  0xc8   : > { %v5598_v57 = vpop.permute.xlu1 %928  ;;  %v5600_v37 = vpop.permute.xlu0 %923  ;;  %v2293_v0 = vcombine.high %v5194_v29, %v5194_v29  ;;  %v2240_v29 = vcombine.high %v5436_v24, %v5436_v24 }
  0xc9   : > { %3295 = vperm.xlu1 %4621, %v2588_v40   ;;  %3283 = vperm.xlu0 %4620, %v2587_v49   ;;  %v4486_v40 = vrot.slane %v2172_v59, 9  ;;  %v4484_v49 = vrot.slane %v2156_v36, 9  ;;  %v4488_v30 = vrot.slane %v2173_v14, 9  ;;  %v2596_v12 = vmax.f32 %v2171_v17, %v4487_v53 }
  0xca   : > { %v2223_v17 = vcombine.high %v5427_v19, %v5427_v19 }
  0xcb   : > { %v2595_v34 = vmax.f32 %v2172_v59, %v4486_v40  ;;  %v2593_v7 = vmax.f32 %v2156_v36, %v4484_v49  ;;  %v2190_v59 = vcombine.high %v2188_v55, %v2188_v55  ;;  %v2208_v36 = vcombine.high %v5128_v61, %v5128_v61 }
  0xcc   : > { %v5605_v39 = vpop.permute.xlu1 %938  ;;  %v5607_v6 = vpop.permute.xlu0 %933  ;;  %v2207_v49 = vcombine.high %v2205_v26, %v2205_v26  ;;  %v2276_v61 = vcombine.high %v5208_v62, %v5208_v62  ;;  %v2225_v62 = vcombine.high %v5115_v50, %v5115_v50  ;;  %v2604_v50 = vmax.f32 %v2205_v26, %v4495_v23 }
  0xcd   : > { %6712 = vst [vmem:[#allocation5_spill] sm:$0xff] %v5605_v39  ;;  %6713 = vst [vmem:[#allocation4_spill] sm:$0xff] %v5607_v6  ;;  %4638 = vperm.xlu1 %4621, %v6714_v46   ;;  %3307 = vperm.xlu0 %4620, %v2589_v31   ;;  %v2597_v31 = vmax.f32 %v2173_v14, %v4488_v30  ;;  %v4491_v14 = vrot.slane %v2188_v55, 9  ;;  %v2274_v26 = vcombine.high %v5486_v45, %v5486_v45 }
  0xce   : > { %v2307_v23 = vrot.slane %v2293_v0, %v5338_v38 }
  0xd0   : > { %v5614_v63 = vpop.permute.xlu1 %948  ;;  %v5616_v60 = vpop.permute.xlu0 %943 }
  0xd1   : > { %6715 = vst [vmem:[#allocation16_spill] sm:$0xff] %v5614_v63  ;;  %3343 = vperm.xlu1 %4621, %v2592_v1   ;;  %3331 = vperm.xlu0 %4620, %v2591_v16   ;;  %v2206_v1 = vcombine.high %v5422_v28, %v5422_v28  ;;  %v2222_v28 = vrot.slane %v2208_v36, %v5338_v38  ;;  %v3035_v63 = vunpack.c.l.s4 %v4772_v56 }
  0xd3   : > { %v4494_v30 = vrot.slane %v2206_v1, 9  ;;  %v2224_v47 = vcombine.high %v2222_v28, %v2222_v28  ;;  %v4499_v18 = vrot.slane %v2222_v28, 9 }
  0xd4   : > { %v5621_v46 = vpop.permute.xlu1 %958  ;;  %v5625_v15 = vpop.permute.xlu0 %953 }
  0xd5   : > { %6716 = vst [vmem:[#allocation17_spill] sm:$0xff] %v5621_v46  ;;  %6717 = vst [vmem:[#allocation18_spill] sm:$0xff] %v5625_v15  ;;  %3379 = vperm.xlu1 %4621, %v2595_v34   ;;  %3355 = vperm.xlu0 %4620, %v2593_v7   ;;  %v4492_v34 = vrot.slane %v2190_v59, 9  ;;  %v2242_v7 = vcombine.high %v5170_v54, %v5170_v54  ;;  %v2603_v36 = vmax.f32 %v2206_v1, %v4494_v30 }
  0xd6   : > { %v6722_v54 = vpack.i.bf16 %v5441_v41, %v5431_v11  ;;  %v4496_v46 = vrot.slane %v2207_v49, 9  ;;  %v4506_v41 = vrot.slane %v2257_v20, 9 }
  0xd7   : > { %v2601_v19 = vmax.f32 %v2190_v59, %v4492_v34  ;;  %v2290_v59 = vrot.slane %v2276_v61, %v5338_v38  ;;  %v2256_v1 = vrot.slane %v2242_v7, %v5338_v38  ;;  %v4500_v34 = vrot.slane %v2224_v47, 9 }
  0xd8   : > { %v5631_v40 = vpop.permute.xlu1 %968  ;;  %v5634_v16 = vpop.permute.xlu0 %963  ;;  %v2308_v61 = vcombine.high %v5491_v51, %v5491_v51  ;;  %v5683_v45 = vmax.f32 %v2257_v20, %v4506_v41  ;;  %v6725_v20 = vpack.i.bf16 %v5451_v44, %v5447_v58 }
  0xd9   : > { %6718 = vst [vmem:[#allocation19_spill] sm:$0xff] %v5631_v40  ;;  %6719 = vst [vmem:[#allocation20_spill] sm:$0xff] %v5634_v16  ;;  %3403 = vperm.xlu1 %4621, %v2597_v31   ;;  %3391 = vperm.xlu0 %4620, %v2596_v12   ;;  %v2291_v31 = vcombine.high %v5462_v2, %v5462_v2  ;;  %v2259_v2 = vcombine.high %v5157_v33, %v5157_v33  ;;  %v4519_v16 = vrot.slane %v2307_v23, 9 }
  0xda   : > { %v2292_v30 = vcombine.high %v2290_v59, %v2290_v59  ;;  %v2258_v33 = vcombine.high %v2256_v1, %v2256_v1  ;;  %v5677_v24 = vmax.f32 %v2224_v47, %v4500_v34 }
  0xdb   : > { %v4514_v11 = vrot.slane %v2291_v31, 9  ;;  %v2273_v7 = vrot.slane %v2259_v2, %v5338_v38  ;;  %v4507_v2 = vrot.slane %v2256_v1, 9 }
  0xdc   : > { %v5643_v53 = vpop.permute.xlu1 %978  ;;  %v5649_v12 = vpop.permute.xlu0 %973  ;;  %v4516_v0 = vrot.slane %v2292_v30, 9 }
  0xdd   : > { %6720 = vst [vmem:[#allocation21_spill] sm:$0xff] %v5643_v53  ;;  %6721 = vst [vmem:[#allocation22_spill] sm:$0xff] %v5649_v12  ;;  %3427 = vperm.xlu1 %4621, %v2599_v10   ;;  %4643 = vperm.xlu0 %4620, %v6722_v54   ;;  %v2600_v53 = vmax.f32 %v2188_v55, %v4491_v14  ;;  %v4498_v12 = vrot.slane %v2223_v17, 9  ;;  %v2239_v14 = vrot.slane %v2225_v62, %v5338_v38 }
  0xde   : > { %v2605_v54 = vmax.f32 %v2207_v49, %v4496_v46  ;;  %v4515_v62 = vrot.slane %v2290_v59, 9  ;;  %v2275_v4 = vcombine.high %v2273_v7, %v2273_v7  ;;  %v5681_v51 = vmax.f32 %v2291_v31, %v4514_v11  ;;  %v6726_v11 = vld [vmem:[#allocation9_spill] sm:$0xff] }
  0xdf   : > { %v4502_v46 = vrot.slane %v2240_v29, 9  ;;  %v4518_v49 = vrot.slane %v2308_v61, 9  ;;  %v4503_v47 = vrot.slane %v2239_v14, 9  ;;  %v5693_v41 = vmax.f32 %v2256_v1, %v4507_v2 }
  0xe0   : > { %v5662_v10 = vpop.permute.xlu1 %988  ;;  %v5664_v55 = vpop.permute.xlu0 %983  ;;  %v5685_v5 = vmax.f32 %v2290_v59, %v4515_v62  ;;  %v5695_v39 = vmax.f32 %v2292_v30, %v4516_v0  ;;  %v5700_v62 = vld [vmem:[%s6646_s3] ss:$0 sm:$0xff] }
  0xe1   : > { %6723 = vst [vmem:[#allocation23_spill] sm:$0xff] %v5662_v10  ;;  %6724 = vst [vmem:[#allocation24_spill] sm:$0xff] %v5664_v55  ;;  %3451 = vperm.xlu1 %4621, %v2601_v19   ;;  %3439 = vperm.xlu0 %4620, %v2600_v53   ;;  %v2608_v19 = vmax.f32 %v2222_v28, %v4499_v18  ;;  %v2607_v10 = vmax.f32 %v2223_v17, %v4498_v12  ;;  %v4508_v18 = vrot.slane %v2258_v33, 9 }
  0xe2   : > { %v2241_v55 = vcombine.high %v2239_v14, %v2239_v14  ;;  %v2309_v53 = vcombine.high %v2307_v23, %v2307_v23  ;;  %v4510_v28 = vrot.slane %v2274_v26, 9  ;;  %v4511_v17 = vrot.slane %v2273_v7, 9 }
  0xe3   : > { %v5702_v9 = vmax.f32 %v2258_v33, %v4508_v18  ;;  %v5704_v58 = vmax.f32 %v2240_v29, %v4502_v46  ;;  %v5706_v44 = vmax.f32 %v2308_v61, %v4518_v49  ;;  %v5713_v0 = vmax.f32 %v2239_v14, %v4503_v47 }
  0xe4   : > { %v5675_v40 = vpop.permute.xlu1 %1098  ;;  %v5679_v15 = vpop.permute.xlu0 %1095  ;;  %v4504_v12 = vrot.slane %v2241_v55, 9  ;;  %v4520_v27 = vrot.slane %v2309_v53, 9  ;;  %v5708_v1 = vmax.f32 %v2274_v26, %v4510_v28  ;;  %v5720_v18 = vmax.f32 %v2307_v23, %v4519_v16 }
  0xe5   : > { %3487 = vperm.xlu1 %4621, %v2604_v50   ;;  %3475 = vperm.xlu0 %4620, %v2603_v36   ;;  %v4512_v50 = vrot.slane %v2275_v4, 9  ;;  %v5691_v36 = vsub.s32 0, %v6726_v11  ;;  %vm1191_vm3 = vcmp.eq.s32.totalorder %v5675_v40, 1  ;;  %v3036_v46 = vunpack.c.0.s8 %v3035_v63 }
  0xe6   : > { %v5722_v61 = vmax.f32 %v2309_v53, %v4520_v27  ;;  %vm1190_vm4 = vcmp.eq.s32.totalorder %v5679_v15, 1 }
  0xe7   : > { %v5724_v26 = vmax.f32 %v2275_v4, %v4512_v50  ;;  %v5743_v15 = vsub.s32 %v3036_v46, %v6726_v11 }
  0xe8   : > { %v1105_v34 = vpop.permute.xlu1 %1104  ;;  %v1102_v31 = vpop.permute.xlu0 %1101 }
  0xe9   : > { %4648 = vperm.xlu1 %4621, %v6725_v20   ;;  %3499 = vperm.xlu0 %4620, %v2605_v54   ;;  %v5711_v54 = vmax.f32 %v2273_v7, %v4511_v17  ;;  %v5715_v20 = vmax.f32 %v2241_v55, %v4504_v12  ;;  %vm1192_vm1 = vcmp.eq.s32.totalorder %v1102_v31, 1  ;;  %vm1193_vm5 = vcmp.eq.s32.totalorder %v1105_v34, 1  ;;  %6728 = vst [vmem:[#allocation9_spill] sm:$0xff] %v5743_v15 }
  0xec   : > { %v5717_v42 = vpop.permute.xlu1 %1110 }
  0xed   : > { %3535 = vperm.xlu1 %4621, %v2608_v19   ;;  %3523 = vperm.xlu0 %4620, %v2607_v10  }
  0xee   : > { %v4554_v59 = vpop.f32.mrb[0].mxu0  ;;  %v4570_v6 = vpop.f32.mrb[0].mxu1 }
  0xef   : > { %v993_v30 = vmul.f32 %v4554_v59, %v5526_v3  ;;  %v544_v2 = vpop.f32.mrb[1].mxu0  ;;  %v608_v56 = vpop.f32.mrb[1].mxu1 }
  0xf0   : > { %v991_v33 = vmul.f32 %v5528_v43, %v544_v2  ;;  %v4555_v29 = vpop.f32.mrb[2].mxu0  ;;  %v5727_v3 = vpop.permute.xlu0 %1107  ;;  %v1009_v43 = vmul.f32 %v4570_v6, %v5600_v37  ;;  %v1007_v4 = vmul.f32 %v5591_v22, %v608_v56  ;;  %v6727_v6 = vpack.i.bf16 %v5472_v52, %v5469_v8 }
  0xf1   : > { %v1032_v14 = vadd.f32 %v5700_v62, %v993_v30  ;;  %v994_v55 = vmul.f32 %v4555_v29, %v5535_v35  ;;  %v4571_v7 = vpop.f32.mrb[2].mxu1  ;;  %v547_v16 = vpop.f32.mrb[3].mxu0  ;;  %vm1194_vm8 = vcmp.eq.s32.totalorder %v5727_v3, 1  ;;  %3547 = vperm.xlu0 %4620, %v5677_v24  }
  0xf2   : > { %v1030_v27 = vadd.f32 %v5700_v62, %v991_v33  ;;  %v611_v23 = vpop.f32.mrb[3].mxu1  ;;  %v992_v49 = vmul.f32 %v5537_v48, %v547_v16  ;;  %v5737_v35 = vpop.permute.xlu1 %1116  ;;  %4653 = vperm.xlu1 %4621, %v6727_v6   ;;  %v5748_v17 = vadd.f32 %v5700_v62, %v1009_v43  ;;  %v5751_v47 = vadd.f32 %v5700_v62, %v1007_v4 }
  0xf3   : > { %v1224_v53 = vsel %vm1192_vm1, %v1032_v14, 0.0  ;;  %v1033_v19 = vadd.f32 %v5700_v62, %v994_v55  ;;  %v1010_v29 = vmul.f32 %v4571_v7, %v5598_v57  ;;  %v1008_v55 = vmul.f32 %v5589_v25, %v611_v23 }
  0xf4   : > { %vm1256_vm6 = vcmp.ge.f32.partialorder %v1224_v53, 0.0  ;;  %v1288_v63 = vmul.f32 0.1, %v1224_v53  ;;  %v1222_v10 = vsel %vm1190_vm4, %v1030_v27, 0.0  ;;  %v1114_v37 = vpop.permute.xlu0 %1113  ;;  %v1031_v50 = vadd.f32 %v5700_v62, %v992_v49 }
  0xf5   : > { %vm1254_vm7 = vcmp.ge.f32.partialorder %v1222_v10, 0.0  ;;  %v1286_v22 = vmul.f32 0.1, %v1222_v10  ;;  %v1225_v28 = vsel %vm1193_vm5, %v1033_v19, 0.0  ;;  %vm1196_vm11 = vcmp.eq.s32.totalorder %v1114_v37, 1  ;;  %3619 = vperm.xlu0 %4620, %v5683_v45  }
  0xf6   : > { %v1320_v48 = vsel %vm1256_vm6, %v1224_v53, %v1288_v63  ;;  %v4558_v12 = vpop.f32.mrb[4].mxu0  ;;  %v4574_v8 = vpop.f32.mrb[4].mxu1  ;;  %v1289_v34 = vmul.f32 0.1, %v1225_v28  ;;  %vm1257_vm9 = vcmp.ge.f32.partialorder %v1225_v28, 0.0  ;;  %3715 = vperm.xlu1 %4621, %v5681_v51   ;;  %v5787_v45 = vadd.f32 %v5700_v62, %v1010_v29 }
  0xf7   : > { %v1318_v52 = vsel %vm1254_vm7, %v1222_v10, %v1286_v22  ;;  %v997_v31 = vmul.f32 %v4558_v12, %v5553_v13  ;;  %v560_v11 = vpop.f32.mrb[5].mxu0  ;;  %v5755_v59 = vpop.f32.mrb[5].mxu1  ;;  %v5760_v2 = vmul.f32 %v4574_v8, %v5616_v60  ;;  %v1223_v13 = vsel %vm1191_vm3, %v1031_v50, 0.0 }
  0xf8   : > { %v1382_v30 = vmax.f32 %v1318_v52, %v1320_v48  ;;  %v5757_v24 = vpop.permute.xlu1 %1122  ;;  %v995_v56 = vmul.f32 %v5546_v21, %v560_v11  ;;  %v5763_v33 = vpop.f32.mrb[6].mxu0  ;;  %vm1255_vm13 = vcmp.ge.f32.partialorder %v1223_v13, 0.0  ;;  %v1321_v25 = vsel %vm1257_vm9, %v1225_v28, %v1289_v34 }
  0xf9   : > { %v5766_v14 = vpop.permute.xlu0 %1119  ;;  %v1036_v46 = vadd.f32 %v5700_v62, %v997_v31  ;;  %v5773_v60 = vpop.f32.mrb[6].mxu1  ;;  %v1287_v7 = vmul.f32 0.1, %v1223_v13  ;;  %3631 = vperm.xlu0 %4620, %v5693_v41   ;;  %vm1197_vm0 = vcmp.eq.s32.totalorder %v5737_v35, 1  ;;  %vm2958_vm3 = vcmask 1045509  }
  0xfa   : > { %v1414_v21 = vcombine.high %v1382_v30, %v1382_v30  ;;  %v1421_v43 = vrot.slane %v1382_v30, %v5338_v38  ;;  %v5777_v57 = vpop.f32.mrb[7].mxu0  ;;  %v5779_v40 = vpop.f32.mrb[7].mxu1  ;;  %v1034_v27 = vadd.f32 %v5700_v62, %v995_v56  ;;  %3727 = vperm.xlu1 %4621, %v5685_v5   ;;  %v5801_v5 = vadd.f32 %v5700_v62, %v1008_v55 }
  0xfb   : > { %v1228_v51 = vsel %vm1196_vm11, %v1036_v46, 0.0  ;;  %v1319_v19 = vsel %vm1255_vm13, %v1223_v13, %v1287_v7  ;;  %vm2960_vm4 = vcmask 1046534   ;;  %vm2962_vm5 = vcmask 1047559  }
  0xfc   : > { %v1428_v4 = vrot.slane %v1414_v21, %v5338_v38  ;;  %v1429_v16 = vcombine.high %v1421_v43, %v1421_v43  ;;  %v4393_v23 = vrot.slane %v1421_v43, 9  ;;  %v5784_v53 = vpop.permute.xlu1 %1128  ;;  %vm1260_vm15 = vcmp.ge.f32.partialorder %v1228_v51, 0.0 }
  0xfd   : > { %v5789_v49 = vpop.permute.xlu0 %1125  ;;  %v1292_v63 = vmul.f32 0.1, %v1228_v51  ;;  %v1226_v10 = vsel %vm1194_vm8, %v1034_v27, 0.0  ;;  %v1383_v8 = vmax.f32 %v1319_v19, %v1321_v25  ;;  %3643 = vperm.xlu0 %4620, %v5702_v9   ;;  %vm1195_vm6 = vcmp.eq.s32.totalorder %v5717_v42, 1 }
  0xfe   : > { %v1430_v37 = vcombine.high %v1428_v4, %v1428_v4  ;;  %v4394_v6 = vrot.slane %v1429_v16, 9  ;;  %v4395_v22 = vrot.slane %v1428_v4, 9  ;;  %v1942_v28 = vmax.f32 %v1421_v43, %v4393_v23  ;;  %v5795_v48 = vpop.f32.mrb[8].mxu0  ;;  %v5797_v12 = vpop.f32.mrb[8].mxu1  ;;  %3739 = vperm.xlu1 %4621, %v5695_v39  }
  0xff   : > { %v1324_v3 = vsel %vm1260_vm15, %v1228_v51, %v1292_v63  ;;  %v5804_v52 = vpop.f32.mrb[9].mxu0  ;;  %v5806_v34 = vpop.f32.mrb[9].mxu1  ;;  %vm1258_vm1 = vcmp.ge.f32.partialorder %v1226_v10, 0.0  ;;  %v1431_v29 = vcombine.high %v1383_v8, %v1383_v8  ;;  %v1438_v13 = vrot.slane %v1383_v8, %v5338_v38 }
 0x100   : > { %v4396_v50 = vrot.slane %v1430_v37, 9  ;;  %v1943_v31 = vmax.f32 %v1429_v16, %v4394_v6  ;;  %v1944_v41 = vmax.f32 %v1428_v4, %v4395_v22  ;;  %v5808_v11 = vpop.permute.xlu1 %1134  ;;  %v5810_v30 = vpop.f32.mrb[10].mxu0  ;;  %v2697_v56 = vrot.slane %v1942_v28, %v5691_v36 }
 0x101   : > { %6729 = vst [vmem:[#allocation25_spill] sm:$0xff] %v5808_v11  ;;  %v1290_v55 = vmul.f32 0.1, %v1226_v10  ;;  %v5814_v46 = vpop.permute.xlu0 %1131  ;;  %v5817_v21 = vpop.f32.mrb[10].mxu1  ;;  %v998_v51 = vmul.f32 %v5763_v33, %v5551_v32  ;;  %v1445_v16 = vrot.slane %v1431_v29, %v5338_v38  ;;  %v1446_v39 = vcombine.high %v1438_v13, %v1438_v13  ;;  %v6731_v29 = vld [vmem:[#allocation11_spill] sm:$0xff] }
 0x102   : > { %v1945_v43 = vmax.f32 %v1430_v37, %v4396_v50  ;;  %v2701_v25 = vrot.slane %v1943_v31, %v5691_v36  ;;  %v2705_v7 = vrot.slane %v1944_v41, %v5691_v36  ;;  %v5824_v27 = vpop.f32.mrb[11].mxu0  ;;  %v5826_v4 = vpop.f32.mrb[11].mxu1  ;;  %v4397_v23 = vrot.slane %v1438_v13, 9  ;;  %3571 = vperm.xlu1 %4621, %v5704_v58  }
 0x103   : > { %v1322_v19 = vsel %vm1258_vm1, %v1226_v10, %v1290_v55  ;;  %v1037_v22 = vadd.f32 %v5700_v62, %v998_v51  ;;  %v1447_v33 = vcombine.high %v1445_v16, %v1445_v16  ;;  %v4398_v28 = vrot.slane %v1446_v39, 9 }
 0x104   : > { %v2709_v63 = vrot.slane %v1945_v43, %v5691_v36  ;;  %v2951_v37 = vsel %vm2950_vm10, %v2701_v25, %v2697_v56  ;;  %v1384_v6 = vmax.f32 %v1322_v19, %v1324_v3  ;;  %v5833_v32 = vpop.permute.xlu1 %1140  ;;  %v4399_v8 = vrot.slane %v1445_v16, 9  ;;  %v6730_v3 = vld [vmem:[#allocation12_spill] sm:$0xff] }
 0x105   : > { %v2953_v9 = vsel %vm2952_vm12, %v2705_v7, %v2951_v37  ;;  %v5836_v50 = vpop.permute.xlu0 %1137  ;;  %v1946_v31 = vmax.f32 %v1438_v13, %v4397_v23  ;;  %v6732_v55 = vpack.i.bf16 %v6730_v3, %v6731_v29  ;;  %v4400_v7 = vrot.slane %v1447_v33, 9 }
 0x106   : > { %v2955_v10 = vsel %vm2954_vm14, %v2709_v63, %v2953_v9  ;;  %v1448_v41 = vcombine.high %v1384_v6, %v1384_v6  ;;  %v1455_v56 = vrot.slane %v1384_v6, %v5338_v38  ;;  %v5844_v43 = vpop.f32.mrb[12].mxu0  ;;  %v5846_v25 = vpop.f32.mrb[12].mxu1  ;;  %v1947_v51 = vmax.f32 %v1446_v39, %v4398_v28  ;;  %3763 = vperm.xlu1 %4621, %v5706_v44  }
 0x107   : > { %4658 = vperm.xlu0 %4620, %v6732_v55   ;;  %v1948_v19 = vmax.f32 %v1445_v16, %v4399_v8  ;;  %v1229_v58 = vsel %vm1197_vm0, %v1037_v22, 0.0  ;;  %v5850_v13 = vpop.f32.mrb[13].mxu0  ;;  %v5852_v23 = vpop.f32.mrb[13].mxu1  ;;  %v2713_v63 = vrot.slane %v1946_v31, %v5691_v36  ;;  %v1949_v39 = vmax.f32 %v1447_v33, %v4400_v7  ;;  %v6733_v22 = vld [vmem:[#allocation4_spill] sm:$0xff] }
 0x108   : > { %v1462_v37 = vrot.slane %v1448_v41, %v5338_v38  ;;  %v1463_v6 = vcombine.high %v1455_v56, %v1455_v56  ;;  %v4401_v9 = vrot.slane %v1455_v56, 9  ;;  %v5856_v3 = vpop.permute.xlu1 %1146  ;;  %v5858_v29 = vpop.f32.mrb[14].mxu0  ;;  %v2717_v16 = vrot.slane %v1947_v51, %v5691_v36 }
 0x109   : > { %v2721_v35 = vrot.slane %v1948_v19, %v5691_v36  ;;  %v1011_v28 = vmul.f32 %v6733_v22, %v5755_v59  ;;  %v5865_v8 = vpop.permute.xlu0 %1143  ;;  %v5868_v31 = vpop.f32.mrb[14].mxu1  ;;  %v2957_v41 = vsel %vm2956_vm2, %v2713_v63, %v2955_v10  ;;  %v2725_v59 = vrot.slane %v1949_v39, %v5691_v36 }
 0x10a   : > { %v1464_v55 = vcombine.high %v1462_v37, %v1462_v37  ;;  %v4402_v33 = vrot.slane %v1463_v6, 9  ;;  %v4403_v7 = vrot.slane %v1462_v37, 9  ;;  %v5873_v51 = vpop.f32.mrb[15].mxu0  ;;  %v5875_v19 = vpop.f32.mrb[15].mxu1  ;;  %v2959_v22 = vsel %vm2958_vm3, %v2717_v16, %v2957_v41  ;;  %3679 = vperm.xlu1 %4621, %v5711_v54  }
 0x10b   : > { %3667 = vperm.xlu0 %4620, %v5708_v1   ;;  %6734 = vst [vmem:[#allocation12_spill] sm:$0xff] %v5873_v51  ;;  %v1950_v44 = vmax.f32 %v1455_v56, %v4401_v9  ;;  %v1293_v15 = vmul.f32 0.1, %v1229_v58  ;;  %v2961_v10 = vsel %vm2960_vm4, %v2721_v35, %v2959_v22  ;;  %vm1198_vm7 = vcmp.eq.s32.totalorder %v5766_v14, 1  ;;  %v6735_v9 = vld [vmem:[#allocation16_spill] sm:$0xff] }
 0x10c   : > { %v4404_v63 = vrot.slane %v1464_v55, 9  ;;  %v1951_v1 = vmax.f32 %v1463_v6, %v4402_v33  ;;  %v1952_v51 = vmax.f32 %v1462_v37, %v4403_v7  ;;  %v5887_v11 = vpop.permute.xlu1 %1152  ;;  %v2963_v39 = vsel %vm2962_vm5, %v2725_v59, %v2961_v10  ;;  %v6737_v7 = vld [vmem:[#allocation5_spill] sm:$0xff] }
 0x10d   : > { %v5893_v56 = vadd.f32 %v5700_v62, %v5760_v2  ;;  %vm1261_vm8 = vcmp.ge.f32.partialorder %v1229_v58, 0.0  ;;  %v1014_v16 = vmul.f32 %v5773_v60, %v6735_v9  ;;  %v5897_v41 = vpop.permute.xlu0 %1149  ;;  %vm1201_vm9 = vcmp.eq.s32.totalorder %v5784_v53, 1  ;;  %3021 = vst [vmem:[%s5884_s16] sm:$0xff] %v2963_v39  ;;  %v6736_v60 = vld [vmem:[#allocation6_spill] sm:$0xff]  ;;  %v6740_v9 = vld [vmem:[#allocation8_spill] sm:$0xff] }
 0x10e   : > { %v1953_v37 = vmax.f32 %v1464_v55, %v4404_v63  ;;  %v2729_v6 = vrot.slane %v1950_v44, %v5691_v36  ;;  %v2733_v35 = vrot.slane %v1951_v1, %v5691_v36  ;;  %v2737_v33 = vrot.slane %v1952_v51, %v5691_v36  ;;  %v6738_v63 = vld [vmem:[#allocation3_spill] sm:$0xff]  ;;  %3595 = vperm.xlu1 %4621, %v5715_v20   ;;  %v6742_v20 = vld [vmem:[#allocation10_spill] sm:$0xff] }
 0x10f   : > { %3583 = vperm.xlu0 %4620, %v5713_v0   ;;  %vm1200_vm11 = vcmp.eq.s32.totalorder %v5789_v49, 1  ;;  %v5908_v2 = vadd.f32 %v5700_v62, %v1011_v28  ;;  %v996_v54 = vmul.f32 %v6736_v60, %v5777_v57  ;;  %v1012_v55 = vmul.f32 %v6737_v7, %v5779_v40  ;;  %v6743_v60 = vld [vmem:[#allocation19_spill] sm:$0xff] }
 0x110   : > { %v2741_v59 = vrot.slane %v1953_v37, %v5691_v36  ;;  %v2964_v22 = vsel %vm2950_vm10, %v2733_v35, %v2729_v6  ;;  %v1325_v51 = vsel %vm1261_vm8, %v1229_v58, %v1293_v15  ;;  %v5918_v0 = vadd.f32 %v5700_v62, %v1014_v16  ;;  %v5920_v44 = vpop.permute.xlu1 %1158  ;;  %v6739_v58 = vld [vmem:[#allocation20_spill] sm:$0xff]  ;;  %v6741_v37 = vld [vmem:[#allocation18_spill] sm:$0xff] }
 0x111   : > { %v2965_v28 = vsel %vm2952_vm12, %v2737_v33, %v2964_v22  ;;  %v1035_v10 = vadd.f32 %v5700_v62, %v996_v54  ;;  %v5925_v57 = vadd.f32 %v5700_v62, %v1012_v55  ;;  %v1001_v40 = vmul.f32 %v5795_v48, %v6738_v63  ;;  %v5929_v1 = vpop.permute.xlu0 %1155 }
 0x112   : > { %v5933_v15 = vsel %vm2954_vm14, %v2741_v59, %v2965_v28  ;;  %v1017_v39 = vmul.f32 %v5797_v12, %v6739_v58  ;;  %v999_v16 = vmul.f32 %v6740_v9, %v5804_v52  ;;  %v1015_v6 = vmul.f32 %v6741_v37, %v5806_v34  ;;  %3787 = vperm.xlu1 %4621, %v5722_v61  }
 0x113   : > { %3775 = vperm.xlu0 %4620, %v5720_v18   ;;  %v1227_v48 = vsel %vm1195_vm6, %v1035_v10, 0.0  ;;  %v1040_v35 = vadd.f32 %v5700_v62, %v1001_v40  ;;  %v1002_v33 = vmul.f32 %v5810_v30, %v6742_v20  ;;  %v1018_v54 = vmul.f32 %v5817_v21, %v6743_v60 }
 0x114   : > { %vm1259_vm13 = vcmp.ge.f32.partialorder %v1227_v48, 0.0  ;;  %v1291_v12 = vmul.f32 0.1, %v1227_v48  ;;  %v5950_v52 = vadd.f32 %v5700_v62, %v1017_v39  ;;  %v1038_v34 = vadd.f32 %v5700_v62, %v999_v16  ;;  %v5953_v7 = vpop.permute.xlu1 %1164 }
 0x115   : > { %v1232_v42 = vsel %vm1200_vm11, %v1040_v35, 0.0  ;;  %v5958_v18 = vadd.f32 %v5700_v62, %v1015_v6  ;;  %v1041_v30 = vadd.f32 %v5700_v62, %v1002_v33  ;;  %v5962_v55 = vadd.f32 %v5700_v62, %v1018_v54  ;;  %v5964_v21 = vpop.permute.xlu0 %1161 }
 0x116   : > { %v1323_v59 = vsel %vm1259_vm13, %v1227_v48, %v1291_v12  ;;  %vm1264_vm15 = vcmp.ge.f32.partialorder %v1232_v42, 0.0  ;;  %v1296_v22 = vmul.f32 0.1, %v1232_v42  ;;  %v1230_v28 = vsel %vm1198_vm7, %v1038_v34, 0.0 }
 0x117   : > { %3691 = vperm.xlu0 %4620, %v5724_v26   ;;  %v1385_v49 = vmax.f32 %v1323_v59, %v1325_v51  ;;  %vm1262_vm0 = vcmp.ge.f32.partialorder %v1230_v28, 0.0  ;;  %v1294_v10 = vmul.f32 0.1, %v1230_v28  ;;  %v1233_v63 = vsel %vm1201_vm9, %v1041_v30, 0.0 }
 0x118   : > { %v1328_v40 = vsel %vm1264_vm15, %v1232_v42, %v1296_v22  ;;  %vm1265_vm1 = vcmp.ge.f32.partialorder %v1233_v63, 0.0  ;;  %v1297_v58 = vmul.f32 0.1, %v1233_v63  ;;  %vm1207_vm6 = vcmp.eq.s32.totalorder %v5856_v3, 1  ;;  %v5973_v61 = vpop.permute.xlu1 %1170 }
 0x119   : > { %v1465_v39 = vcombine.high %v1385_v49, %v1385_v49  ;;  %v1472_v9 = vrot.slane %v1385_v49, %v5338_v38  ;;  %v1326_v14 = vsel %vm1262_vm0, %v1230_v28, %v1294_v10  ;;  %v1239_v16 = vsel %vm1207_vm6, %v5801_v5, 0.0  ;;  %v5977_v26 = vpop.permute.xlu0 %1167 }
 0x11a   : > { %v1386_v51 = vmax.f32 %v1326_v14, %v1328_v40  ;;  %v5979_v37 = vsel %vm1265_vm1, %v1233_v63, %v1297_v58  ;;  %vm1271_vm7 = vcmp.ge.f32.partialorder %v1239_v16, 0.0  ;;  %v1303_v53 = vmul.f32 0.1, %v1239_v16 }
 0x11b   : > { %v1479_v6 = vrot.slane %v1465_v39, %v5338_v38  ;;  %v1480_v48 = vcombine.high %v1472_v9, %v1472_v9  ;;  %v4405_v35 = vrot.slane %v1472_v9, 9  ;;  %vm1206_vm8 = vcmp.eq.s32.totalorder %v5865_v8, 1 }
 0x11c   : > { %v1482_v3 = vcombine.high %v1386_v51, %v1386_v51  ;;  %v1489_v20 = vrot.slane %v1386_v51, %v5338_v38  ;;  %v5984_v33 = vsel %vm1271_vm7, %v1239_v16, %v1303_v53  ;;  %v1238_v5 = vsel %vm1206_vm8, %v5751_v47, 0.0  ;;  %v5987_v60 = vpop.permute.xlu1 %1176 }
 0x11d   : > { %v1481_v54 = vcombine.high %v1479_v6, %v1479_v6  ;;  %v4406_v12 = vrot.slane %v1480_v48, 9  ;;  %v4407_v34 = vrot.slane %v1479_v6, 9  ;;  %v1954_v42 = vmax.f32 %v1472_v9, %v4405_v35  ;;  %v5989_v30 = vpop.permute.xlu0 %1173 }
 0x11e   : > { %vm1199_vm9 = vcmp.eq.s32.totalorder %v5757_v24, 1  ;;  %v1496_v59 = vrot.slane %v1482_v3, %v5338_v38  ;;  %v1497_v8 = vcombine.high %v1489_v20, %v1489_v20  ;;  %v4409_v22 = vrot.slane %v1489_v20, 9  ;;  %v6747_v24 = vld [vmem:[#allocation24_spill] sm:$0xff] }
 0x11f   : > { %vm1270_vm11 = vcmp.ge.f32.partialorder %v1238_v5, 0.0  ;;  %v4408_v28 = vrot.slane %v1481_v54, 9  ;;  %v1955_v49 = vmax.f32 %v1480_v48, %v4406_v12  ;;  %v1956_v10 = vmax.f32 %v1479_v6, %v4407_v34 }
 0x120   : > { %v2745_v47 = vrot.slane %v1954_v42, %v5691_v36  ;;  %v1498_v63 = vcombine.high %v1496_v59, %v1496_v59  ;;  %v4410_v40 = vrot.slane %v1497_v8, 9  ;;  %v4411_v58 = vrot.slane %v1496_v59, 9  ;;  %v5994_v14 = vpop.permute.xlu1 %1182 }
 0x121   : > { %v1958_v39 = vmax.f32 %v1489_v20, %v4409_v22  ;;  %v1957_v9 = vmax.f32 %v1481_v54, %v4408_v28  ;;  %v2749_v16 = vrot.slane %v1955_v49, %v5691_v36  ;;  %v2753_v51 = vrot.slane %v1956_v10, %v5691_v36  ;;  %v6000_v35 = vpop.permute.xlu0 %1179  ;;  %v6744_v54 = vld [vmem:[#allocation7_spill] sm:$0xff] }
 0x122   : > { %v2967_v53 = vsel %vm2956_vm2, %v2745_v47, %v5933_v15  ;;  %v4412_v48 = vrot.slane %v1498_v63, 9  ;;  %v1959_v6 = vmax.f32 %v1497_v8, %v4410_v40  ;;  %v1960_v3 = vmax.f32 %v1496_v59, %v4411_v58 }
 0x123   : > { %v2761_v12 = vrot.slane %v1958_v39, %v5691_v36  ;;  %v2757_v34 = vrot.slane %v1957_v9, %v5691_v36  ;;  %v2968_v20 = vsel %vm2958_vm3, %v2749_v16, %v2967_v53  ;;  %v1302_v42 = vmul.f32 0.1, %v1238_v5 }
 0x124   : > { %v1000_v22 = vmul.f32 %v6744_v54, %v5824_v27  ;;  %v2969_v28 = vsel %vm2960_vm4, %v2753_v51, %v2968_v20  ;;  %vm1204_vm13 = vcmp.eq.s32.totalorder %v5836_v50, 1  ;;  %v1961_v15 = vmax.f32 %v1498_v63, %v4412_v48  ;;  %v6011_v8 = vpop.permute.xlu1 %1188  ;;  %v6745_v27 = vld [vmem:[#allocation17_spill] sm:$0xff] }
 0x125   : > { %v2765_v49 = vrot.slane %v1959_v6, %v5691_v36  ;;  %v2769_v59 = vrot.slane %v1960_v3, %v5691_v36  ;;  %v2970_v10 = vsel %vm2962_vm5, %v2757_v34, %v2969_v28  ;;  %v1334_v47 = vsel %vm1270_vm11, %v1238_v5, %v1302_v42  ;;  %v6018_v39 = vpop.permute.xlu0 %1185  ;;  %v6746_v3 = vld [vmem:[#allocation15_spill] sm:$0xff]  ;;  %v6748_v54 = vld [vmem:[#allocation13_spill] sm:$0xff] }
 0x126   : > { %v1039_v40 = vadd.f32 %v5700_v62, %v1000_v22  ;;  %v1016_v58 = vmul.f32 %v6745_v27, %v5826_v4  ;;  %v2773_v9 = vrot.slane %v1961_v15, %v5691_v36  ;;  %vm1209_vm15 = vcmp.eq.s32.totalorder %v5887_v11, 1  ;;  %3022 = vst [vmem:[%s5884_s16 + $0x8] sm:$0xff] %v2970_v10  ;;  %v6749_v10 = vld [vmem:[#allocation22_spill] sm:$0xff] }
 0x127   : > { %v2971_v63 = vsel %vm2950_vm10, %v2765_v49, %v2761_v12  ;;  %vm1208_vm0 = vcmp.eq.s32.totalorder %v5897_v41, 1  ;;  %v1241_v4 = vsel %vm1209_vm15, %v5787_v45, 0.0  ;;  %v1005_v12 = vmul.f32 %v5844_v43, %v6746_v3 }
 0x128   : > { %v2972_v16 = vsel %vm2952_vm12, %v2769_v59, %v2971_v63  ;;  %v1231_v5 = vsel %vm1199_vm9, %v1039_v40, 0.0  ;;  %v6029_v51 = vadd.f32 %v5700_v62, %v1016_v58  ;;  %vm1273_vm6 = vcmp.ge.f32.partialorder %v1241_v4, 0.0  ;;  %v6033_v6 = vpop.permute.xlu1 %3043 }
 0x129   : > { %vm1263_vm1 = vcmp.ge.f32.partialorder %v1231_v5, 0.0  ;;  %v1295_v53 = vmul.f32 0.1, %v1231_v5  ;;  %v2973_v48 = vsel %vm2954_vm14, %v2773_v9, %v2972_v16  ;;  %v1305_v11 = vmul.f32 0.1, %v1241_v4  ;;  %v6040_v20 = vpop.permute.xlu0 %4623 }
 0x12a   : > { %v1240_v41 = vsel %vm1208_vm0, %v5748_v17, 0.0  ;;  %v1021_v34 = vmul.f32 %v5846_v25, %v6747_v24  ;;  %v1003_v22 = vmul.f32 %v6748_v54, %v5850_v13  ;;  %v1044_v49 = vadd.f32 %v5700_v62, %v1005_v12 }
 0x12b   : > { %v1327_v42 = vsel %vm1263_vm1, %v1231_v5, %v1295_v53  ;;  %vm1272_vm7 = vcmp.ge.f32.partialorder %v1240_v41, 0.0  ;;  %v1304_v45 = vmul.f32 0.1, %v1240_v41  ;;  %v1337_v15 = vsel %vm1273_vm6, %v1241_v4, %v1305_v11 }
 0x12c   : > { %v1387_v28 = vmax.f32 %v1327_v42, %v5979_v37  ;;  %v6047_v17 = vadd.f32 %v5700_v62, %v1021_v34  ;;  %v1391_v43 = vmax.f32 %v5984_v33, %v1337_v15  ;;  %v6051_v25 = vadd.f32 %v5700_v62, %v1003_v22  ;;  %v6057_v27 = vpop.permute.xlu1 %3067 }
 0x12d   : > { %v1336_v59 = vsel %vm1272_vm7, %v1240_v41, %v1304_v45  ;;  %v6055_v40 = vmul.f32 %v6749_v10, %v5852_v23  ;;  %v1236_v9 = vsel %vm1204_vm13, %v1044_v49, 0.0  ;;  %v6062_v63 = vpop.permute.xlu0 %3055  ;;  %vm1202_vm9 = vcmp.eq.s32.totalorder %v5814_v46, 1 }
 0x12e   : > { %v1499_v13 = vcombine.high %v1387_v28, %v1387_v28  ;;  %v1506_v37 = vrot.slane %v1387_v28, %v5338_v38  ;;  %v1390_v58 = vmax.f32 %v1334_v47, %v1336_v59  ;;  %6750 = vst [vmem:[#allocation11_spill] sm:$0xff] %v6062_v63  ;;  %v1567_v33 = vcombine.high %v1391_v43, %v1391_v43 }
 0x12f   : > { %v1574_v16 = vrot.slane %v1391_v43, %v5338_v38  ;;  %vm1268_vm8 = vcmp.ge.f32.partialorder %v1236_v9, 0.0  ;;  %v1300_v5 = vmul.f32 0.1, %v1236_v9  ;;  %vm1205_vm11 = vcmp.eq.s32.totalorder %v5833_v32, 1 }
 0x130   : > { %v1513_v4 = vrot.slane %v1499_v13, %v5338_v38  ;;  %v1514_v23 = vcombine.high %v1506_v37, %v1506_v37  ;;  %v4413_v53 = vrot.slane %v1506_v37, 9  ;;  %v1550_v11 = vcombine.high %v1390_v58, %v1390_v58  ;;  %v6068_v50 = vpop.permute.xlu1 %3103 }
 0x131   : > { %v1581_v41 = vrot.slane %v1567_v33, %v5338_v38  ;;  %v1582_v3 = vcombine.high %v1574_v16, %v1574_v16  ;;  %v4429_v12 = vrot.slane %v1574_v16, 9  ;;  %v1557_v47 = vrot.slane %v1390_v58, %v5338_v38  ;;  %6751 = vst [vmem:[#allocation4_spill] sm:$0xff] %v6068_v50  ;;  %v6071_v54 = vpop.permute.xlu0 %3091 }
 0x132   : > { %v1515_v24 = vcombine.high %v1513_v4, %v1513_v4  ;;  %v4414_v34 = vrot.slane %v1514_v23, 9  ;;  %v4415_v42 = vrot.slane %v1513_v4, 9  ;;  %v1962_v45 = vmax.f32 %v1506_v37, %v4413_v53  ;;  %6752 = vst [vmem:[#allocation16_spill] sm:$0xff] %v6071_v54 }
 0x133   : > { %v1583_v22 = vcombine.high %v1581_v41, %v1581_v41  ;;  %v4430_v28 = vrot.slane %v1582_v3, 9  ;;  %v4431_v15 = vrot.slane %v1581_v41, 9  ;;  %v6073_v49 = vmax.f32 %v1574_v16, %v4429_v12 }
 0x134   : > { %v4416_v43 = vrot.slane %v1515_v24, 9  ;;  %v1963_v59 = vmax.f32 %v1514_v23, %v4414_v34  ;;  %v1964_v10 = vmax.f32 %v1513_v4, %v4415_v42  ;;  %v2777_v13 = vrot.slane %v1962_v45, %v5691_v36  ;;  %v6082_v53 = vpop.permute.xlu1 %4628 }
 0x135   : > { %v4432_v58 = vrot.slane %v1583_v22, 9  ;;  %v6076_v33 = vmax.f32 %v1582_v3, %v4430_v28  ;;  %v6078_v50 = vmax.f32 %v1581_v41, %v4431_v15  ;;  %v2841_v37 = vrot.slane %v6073_v49, %v5691_v36  ;;  %v6087_v4 = vpop.permute.xlu0 %3115 }
 0x136   : > { %v1965_v54 = vmax.f32 %v1515_v24, %v4416_v43  ;;  %v2781_v63 = vrot.slane %v1963_v59, %v5691_v36  ;;  %v2785_v16 = vrot.slane %v1964_v10, %v5691_v36  ;;  %v2974_v23 = vsel %vm2956_vm2, %v2777_v13, %v2973_v48 }
 0x137   : > { %v6089_v12 = vmax.f32 %v1583_v22, %v4432_v58  ;;  %v2845_v41 = vrot.slane %v6076_v33, %v5691_v36  ;;  %v2849_v3 = vrot.slane %v6078_v50, %v5691_v36  ;;  %v1564_v34 = vrot.slane %v1550_v11, %v5338_v38 }
 0x138   : > { %v2789_v24 = vrot.slane %v1965_v54, %v5691_v36  ;;  %v2975_v42 = vsel %vm2958_vm3, %v2781_v63, %v2974_v23  ;;  %v1565_v45 = vcombine.high %v1557_v47, %v1557_v47  ;;  %v4425_v48 = vrot.slane %v1557_v47, 9  ;;  %v6102_v59 = vpop.permute.xlu1 %3151 }
 0x139   : > { %v2976_v22 = vsel %vm2960_vm4, %v2785_v16, %v2975_v42  ;;  %v2853_v28 = vrot.slane %v6089_v12, %v5691_v36  ;;  %v1566_v15 = vcombine.high %v1564_v34, %v1564_v34  ;;  %v4427_v43 = vrot.slane %v1564_v34, 9  ;;  %v6106_v58 = vpop.permute.xlu0 %3139 }
 0x13a   : > { %v2977_v11 = vsel %vm2962_vm5, %v2789_v24, %v2976_v22  ;;  %v4426_v10 = vrot.slane %v1565_v45, 9  ;;  %v1974_v13 = vmax.f32 %v1557_v47, %v4425_v48  ;;  %v1332_v54 = vsel %vm1268_vm8, %v1236_v9, %v1300_v5  ;;  %v6753_v5 = vld [vmem:[#allocation14_spill] sm:$0xff]  ;;  %v6754_v48 = vld [vmem:[#allocation23_spill] sm:$0xff] }
 0x13b   : > { %v4428_v63 = vrot.slane %v1566_v15, 9  ;;  %v1976_v33 = vmax.f32 %v1564_v34, %v4427_v43  ;;  %v1234_v16 = vsel %vm1202_vm9, %v6051_v25, 0.0  ;;  %v6113_v23 = vadd.f32 %v5700_v62, %v6055_v40  ;;  %3023 = vst [vmem:[%s5884_s16 + $0x10] sm:$0xff] %v2977_v11 }
 0x13c   : > { %v1975_v12 = vmax.f32 %v1565_v45, %v4426_v10  ;;  %v2825_v24 = vrot.slane %v1974_v13, %v5691_v36  ;;  %vm1266_vm13 = vcmp.ge.f32.partialorder %v1234_v16, 0.0  ;;  %v1298_v47 = vmul.f32 0.1, %v1234_v16  ;;  %v6122_v25 = vpop.permute.xlu1 %3187 }
 0x13d   : > { %v1977_v42 = vmax.f32 %v1566_v15, %v4428_v63  ;;  %v2833_v9 = vrot.slane %v1976_v33, %v5691_v36  ;;  %v1006_v34 = vmul.f32 %v5858_v29, %v6753_v5  ;;  %v1022_v46 = vmul.f32 %v5868_v31, %v6754_v48  ;;  %v6127_v45 = vpop.permute.xlu0 %3163  ;;  %v6755_v31 = vld [vmem:[#allocation25_spill] sm:$0xff]  ;;  %v6756_v63 = vld [vmem:[#allocation12_spill] sm:$0xff] }
 0x13e   : > { %v2829_v40 = vrot.slane %v1975_v12, %v5691_v36  ;;  %v1330_v22 = vsel %vm1266_vm13, %v1234_v16, %v1298_v47  ;;  %vm1211_vm15 = vcmp.eq.s32.totalorder %v5920_v44, 1  ;;  %vm1210_vm0 = vcmp.eq.s32.totalorder %v5929_v1, 1  ;;  %v6757_v1 = vld [vmem:[#allocation2_spill] sm:$0xff] }
 0x13f   : > { %v2837_v15 = vrot.slane %v1977_v42, %v5691_v36  ;;  %v1388_v43 = vmax.f32 %v1330_v22, %v1332_v54  ;;  %v1045_v11 = vadd.f32 %v5700_v62, %v1006_v34  ;;  %v6132_v29 = vadd.f32 %v5700_v62, %v1022_v46 }
 0x140   : > { %vm1203_vm1 = vcmp.eq.s32.totalorder %v6755_v31, 1  ;;  %v2985_v10 = vsel %vm2950_vm10, %v2829_v40, %v2825_v24  ;;  %v1243_v13 = vsel %vm1211_vm15, %v5925_v57, 0.0  ;;  %v1242_v44 = vsel %vm1210_vm0, %v5908_v2, 0.0  ;;  %v6144_v42 = vpop.permute.xlu1 %3211 }
 0x141   : > { %v1004_v33 = vmul.f32 %v6757_v1, %v6756_v63  ;;  %v2986_v16 = vsel %vm2952_vm12, %v2833_v9, %v2985_v10  ;;  %v1516_v12 = vcombine.high %v1388_v43, %v1388_v43  ;;  %v1523_v54 = vrot.slane %v1388_v43, %v5338_v38  ;;  %v6147_v57 = vpop.permute.xlu0 %3199 }
 0x142   : > { %v1237_v47 = vsel %vm1205_vm11, %v1045_v11, 0.0  ;;  %v2987_v5 = vsel %vm2954_vm14, %v2837_v15, %v2986_v16  ;;  %vm1275_vm7 = vcmp.ge.f32.partialorder %v1243_v13, 0.0  ;;  %v1307_v40 = vmul.f32 0.1, %v1243_v13 }
 0x143   : > { %vm1269_vm6 = vcmp.ge.f32.partialorder %v1237_v47, 0.0  ;;  %v1301_v24 = vmul.f32 0.1, %v1237_v47  ;;  %v2988_v2 = vsel %vm2956_vm2, %v2841_v37, %v2987_v5  ;;  %v1530_v9 = vrot.slane %v1516_v12, %v5338_v38 }
 0x144   : > { %v1531_v34 = vcombine.high %v1523_v54, %v1523_v54  ;;  %v4417_v48 = vrot.slane %v1523_v54, 9  ;;  %v2989_v32 = vsel %vm2958_vm3, %v2845_v41, %v2988_v2  ;;  %vm1274_vm8 = vcmp.ge.f32.partialorder %v1242_v44, 0.0  ;;  %v6159_v11 = vpop.permute.xlu1 %3235 }
 0x145   : > { %v1333_v46 = vsel %vm1269_vm6, %v1237_v47, %v1301_v24  ;;  %v2990_v22 = vsel %vm2960_vm4, %v2849_v3, %v2989_v32  ;;  %v1532_v15 = vcombine.high %v1530_v9, %v1530_v9  ;;  %v4419_v49 = vrot.slane %v1530_v9, 9  ;;  %v6163_v1 = vpop.permute.xlu0 %4633  ;;  %v6758_v24 = vld [vmem:[#allocation21_spill] sm:$0xff] }
 0x146   : > { %v4418_v43 = vrot.slane %v1531_v34, 9  ;;  %v2991_v37 = vsel %vm2962_vm5, %v2853_v28, %v2990_v22  ;;  %v1966_v10 = vmax.f32 %v1523_v54, %v4417_v48  ;;  %v1339_v63 = vsel %vm1275_vm7, %v1243_v13, %v1307_v40 }
 0x147   : > { %v1306_v41 = vmul.f32 0.1, %v1242_v44  ;;  %v4420_v16 = vrot.slane %v1532_v15, 9  ;;  %v1968_v47 = vmax.f32 %v1530_v9, %v4419_v49  ;;  %v1043_v50 = vadd.f32 %v5700_v62, %v1004_v33  ;;  %3025 = vst [vmem:[%s5884_s16 + $0x20] sm:$0xff] %v2991_v37 }
 0x148   : > { %v1967_v12 = vmax.f32 %v1531_v34, %v4418_v43  ;;  %v2793_v3 = vrot.slane %v1966_v10, %v5691_v36  ;;  %v1020_v2 = vmul.f32 %v6758_v24, %v5875_v19  ;;  %vm1213_vm9 = vcmp.eq.s32.totalorder %v5953_v7, 1  ;;  %v6176_v34 = vpop.permute.xlu1 %3259 }
 0x149   : > { %v1338_v5 = vsel %vm1274_vm8, %v1242_v44, %v1306_v41  ;;  %v1969_v28 = vmax.f32 %v1532_v15, %v4420_v16  ;;  %v2801_v54 = vrot.slane %v1968_v47, %v5691_v36  ;;  %v1235_v9 = vsel %vm1203_vm1, %v1043_v50, 0.0  ;;  %v6182_v19 = vpop.permute.xlu0 %3247 }
 0x14a   : > { %v2797_v13 = vrot.slane %v1967_v12, %v5691_v36  ;;  %vm1267_vm11 = vcmp.ge.f32.partialorder %v1235_v9, 0.0  ;;  %v1299_v33 = vmul.f32 0.1, %v1235_v9  ;;  %v6179_v48 = vadd.f32 %v5700_v62, %v1020_v2 }
 0x14b   : > { %v1245_v44 = vsel %vm1213_vm9, %v5918_v0, 0.0  ;;  %v2805_v7 = vrot.slane %v1969_v28, %v5691_v36  ;;  %vm1212_vm15 = vcmp.eq.s32.totalorder %v5964_v21, 1  ;;  %vm1215_vm0 = vcmp.eq.s32.totalorder %v5973_v61, 1 }
 0x14c   : > { %v2978_v32 = vsel %vm2950_vm10, %v2797_v13, %v2793_v3  ;;  %vm1277_vm13 = vcmp.ge.f32.partialorder %v1245_v44, 0.0  ;;  %v1309_v40 = vmul.f32 0.1, %v1245_v44  ;;  %v1331_v22 = vsel %vm1267_vm11, %v1235_v9, %v1299_v33  ;;  %v6191_v49 = vpop.permute.xlu1 %3295 }
 0x14d   : > { %v2979_v31 = vsel %vm2952_vm12, %v2801_v54, %v2978_v32  ;;  %v1389_v15 = vmax.f32 %v1331_v22, %v1333_v46  ;;  %v1244_v0 = vsel %vm1212_vm15, %v5893_v56, 0.0  ;;  %v1247_v41 = vsel %vm1215_vm0, %v6029_v51, 0.0  ;;  %v6194_v16 = vpop.permute.xlu0 %3283 }
 0x14e   : > { %v2980_v62 = vsel %vm2954_vm14, %v2805_v7, %v2979_v31  ;;  %v1341_v43 = vsel %vm1277_vm13, %v1245_v44, %v1309_v40  ;;  %vm1276_vm1 = vcmp.ge.f32.partialorder %v1244_v0, 0.0  ;;  %v1308_v10 = vmul.f32 0.1, %v1244_v0 }
 0x14f   : > { %v1393_v37 = vmax.f32 %v1339_v63, %v1341_v43  ;;  %v1533_v12 = vcombine.high %v1389_v15, %v1389_v15  ;;  %v1540_v21 = vrot.slane %v1389_v15, %v5338_v38  ;;  %vm1279_vm6 = vcmp.ge.f32.partialorder %v1247_v41, 0.0 }
 0x150   : > { %v1311_v61 = vmul.f32 0.1, %v1247_v41  ;;  %v1340_v50 = vsel %vm1276_vm1, %v1244_v0, %v1308_v10  ;;  %vm1214_vm7 = vcmp.eq.s32.totalorder %v5977_v26, 1  ;;  %v6200_v2 = vpop.permute.xlu1 %4638  ;;  %vm1217_vm9 = vcmp.eq.s32.totalorder %v5987_v60, 1 }
 0x151   : > { %v1601_v46 = vcombine.high %v1393_v37, %v1393_v37  ;;  %v1608_v47 = vrot.slane %v1393_v37, %v5338_v38  ;;  %v1547_v56 = vrot.slane %v1533_v12, %v5338_v38  ;;  %v1548_v63 = vcombine.high %v1540_v21, %v1540_v21  ;;  %v6205_v9 = vpop.permute.xlu0 %3307 }
 0x152   : > { %v4421_v3 = vrot.slane %v1540_v21, 9  ;;  %v1392_v24 = vmax.f32 %v1338_v5, %v1340_v50  ;;  %v6203_v54 = vsel %vm1279_vm6, %v1247_v41, %v1311_v61  ;;  %vm1216_vm11 = vcmp.eq.s32.totalorder %v5989_v30, 1 }
 0x153   : > { %v1615_v51 = vrot.slane %v1601_v46, %v5338_v38  ;;  %v1616_v28 = vcombine.high %v1608_v47, %v1608_v47  ;;  %v4437_v13 = vrot.slane %v1608_v47, 9  ;;  %v1549_v33 = vcombine.high %v1547_v56, %v1547_v56 }
 0x154   : > { %v4422_v44 = vrot.slane %v1548_v63, 9  ;;  %v4423_v7 = vrot.slane %v1547_v56, 9  ;;  %v1970_v32 = vmax.f32 %v1540_v21, %v4421_v3  ;;  %v6210_v10 = vpop.permute.xlu1 %3343  ;;  %v1248_v60 = vsel %vm1216_vm11, %v5950_v52, 0.0 }
 0x155   : > { %v1617_v40 = vcombine.high %v1615_v51, %v1615_v51  ;;  %v4438_v31 = vrot.slane %v1616_v28, 9  ;;  %v4439_v22 = vrot.slane %v1615_v51, 9  ;;  %v6207_v15 = vmax.f32 %v1608_v47, %v4437_v13  ;;  %v6218_v46 = vpop.permute.xlu0 %3331 }
 0x156   : > { %v4424_v5 = vrot.slane %v1549_v33, 9  ;;  %v1971_v43 = vmax.f32 %v1548_v63, %v4422_v44  ;;  %v1972_v0 = vmax.f32 %v1547_v56, %v4423_v7  ;;  %v2809_v37 = vrot.slane %v1970_v32, %v5691_v36 }
 0x157   : > { %v4440_v41 = vrot.slane %v1617_v40, 9  ;;  %v6212_v12 = vmax.f32 %v1616_v28, %v4438_v31  ;;  %v6214_v61 = vmax.f32 %v1615_v51, %v4439_v22  ;;  %v2873_v21 = vrot.slane %v6207_v15, %v5691_v36 }
 0x158   : > { %v1973_v50 = vmax.f32 %v1549_v33, %v4424_v5  ;;  %v2813_v47 = vrot.slane %v1971_v43, %v5691_v36  ;;  %v2817_v63 = vrot.slane %v1972_v0, %v5691_v36  ;;  %v2981_v56 = vsel %vm2956_vm2, %v2809_v37, %v2980_v62  ;;  %v6235_v32 = vpop.permute.xlu1 %3379 }
 0x159   : > { %v6223_v3 = vmax.f32 %v1617_v40, %v4440_v41  ;;  %v2877_v28 = vrot.slane %v6212_v12, %v5691_v36  ;;  %v1584_v13 = vcombine.high %v1392_v24, %v1392_v24  ;;  %v1591_v33 = vrot.slane %v1392_v24, %v5338_v38  ;;  %v6241_v5 = vpop.permute.xlu0 %3355 }
 0x15a   : > { %v2821_v44 = vrot.slane %v1973_v50, %v5691_v36  ;;  %v2982_v7 = vsel %vm2958_vm3, %v2813_v47, %v2981_v56  ;;  %v1246_v62 = vsel %vm1214_vm7, %v5958_v18, 0.0  ;;  %vm1219_vm15 = vcmp.eq.s32.totalorder %v5994_v14, 1 }
 0x15b   : > { %v2983_v40 = vsel %vm2960_vm4, %v2817_v63, %v2982_v7  ;;  %v1598_v22 = vrot.slane %v1584_v13, %v5338_v38  ;;  %vm1278_vm8 = vcmp.ge.f32.partialorder %v1246_v62, 0.0  ;;  %v1599_v24 = vcombine.high %v1591_v33, %v1591_v33 }
 0x15c   : > { %v2984_v43 = vsel %vm2962_vm5, %v2821_v44, %v2983_v40  ;;  %v4433_v0 = vrot.slane %v1591_v33, 9  ;;  %v1310_v37 = vmul.f32 0.1, %v1246_v62  ;;  %v1249_v63 = vsel %vm1217_vm9, %v5962_v55, 0.0  ;;  %v6248_v56 = vpop.permute.xlu1 %3403 }
 0x15d   : > { %v1600_v26 = vcombine.high %v1598_v22, %v1598_v22  ;;  %v4435_v41 = vrot.slane %v1598_v22, 9  ;;  %3024 = vst [vmem:[%s5884_s16 + $0x18] sm:$0xff] %v2984_v43  ;;  %v4434_v18 = vrot.slane %v1599_v24, 9  ;;  %vm1281_vm13 = vcmp.ge.f32.partialorder %v1249_v63, 0.0  ;;  %v6250_v40 = vpop.permute.xlu0 %3391 }
 0x15e   : > { %v1982_v50 = vmax.f32 %v1591_v33, %v4433_v0  ;;  %v1342_v47 = vsel %vm1278_vm8, %v1246_v62, %v1310_v37  ;;  %v1313_v44 = vmul.f32 0.1, %v1249_v63  ;;  %vm1280_vm0 = vcmp.ge.f32.partialorder %v1248_v60, 0.0 }
 0x15f   : > { %v4436_v13 = vrot.slane %v1600_v26, 9  ;;  %v1984_v7 = vmax.f32 %v1598_v22, %v4435_v41  ;;  %v1983_v31 = vmax.f32 %v1599_v24, %v4434_v18  ;;  %v1312_v43 = vmul.f32 0.1, %v1248_v60 }
 0x160   : > { %v2857_v51 = vrot.slane %v1982_v50, %v5691_v36  ;;  %v1345_v62 = vsel %vm1281_vm13, %v1249_v63, %v1313_v44  ;;  %v1251_v0 = vsel %vm1219_vm15, %v6179_v48, 0.0  ;;  %v6259_v37 = vpop.permute.xlu1 %3427  ;;  %vm1218_vm6 = vcmp.eq.s32.totalorder %v6000_v35, 1 }
 0x161   : > { %v1985_v30 = vmax.f32 %v1600_v26, %v4436_v13  ;;  %v2865_v33 = vrot.slane %v1984_v7, %v5691_v36  ;;  %v2861_v55 = vrot.slane %v1983_v31, %v5691_v36  ;;  %v1395_v22 = vmax.f32 %v6203_v54, %v1345_v62  ;;  %v6263_v14 = vpop.permute.xlu0 %4643 }
 0x162   : > { %vm1283_vm1 = vcmp.ge.f32.partialorder %v1251_v0, 0.0  ;;  %v1315_v52 = vmul.f32 0.1, %v1251_v0  ;;  %v1344_v18 = vsel %vm1280_vm0, %v1248_v60, %v1312_v43  ;;  %v1250_v63 = vsel %vm1218_vm6, %v6113_v23, 0.0 }
 0x163   : > { %v2869_v24 = vrot.slane %v1985_v30, %v5691_v36  ;;  %v2992_v26 = vsel %vm2950_vm10, %v2861_v55, %v2857_v51  ;;  %v1635_v41 = vcombine.high %v1395_v22, %v1395_v22  ;;  %v1642_v31 = vrot.slane %v1395_v22, %v5338_v38 }
 0x164   : > { %v2993_v54 = vsel %vm2952_vm12, %v2865_v33, %v2992_v26  ;;  %v1394_v50 = vmax.f32 %v1342_v47, %v1344_v18  ;;  %v6268_v48 = vsel %vm1283_vm1, %v1251_v0, %v1315_v52  ;;  %v6273_v30 = vpop.permute.xlu1 %3451  ;;  %vm1282_vm7 = vcmp.ge.f32.partialorder %v1250_v63, 0.0 }
 0x165   : > { %v2994_v13 = vsel %vm2954_vm14, %v2869_v24, %v2993_v54  ;;  %v1649_v7 = vrot.slane %v1635_v41, %v5338_v38  ;;  %v1650_v35 = vcombine.high %v1642_v31, %v1642_v31  ;;  %v4445_v44 = vrot.slane %v1642_v31, 9  ;;  %v6280_v33 = vpop.permute.xlu0 %3439 }
 0x166   : > { %v2995_v51 = vsel %vm2956_vm2, %v2873_v21, %v2994_v13  ;;  %v1618_v60 = vcombine.high %v1394_v50, %v1394_v50  ;;  %v1625_v47 = vrot.slane %v1394_v50, %v5338_v38  ;;  %v6759_v15 = vrot.slane %v6214_v61, %v5691_v36 }
 0x167   : > { %v2996_v23 = vsel %vm2958_vm3, %v2877_v28, %v2995_v51  ;;  %v1651_v62 = vcombine.high %v1649_v7, %v1649_v7  ;;  %v4446_v55 = vrot.slane %v1650_v35, 9  ;;  %v4447_v22 = vrot.slane %v1649_v7, 9 }
 0x168   : > { %v2997_v21 = vsel %vm2960_vm4, %v6759_v15, %v2996_v23  ;;  %v1994_v43 = vmax.f32 %v1642_v31, %v4445_v44  ;;  %v1632_v0 = vrot.slane %v1618_v60, %v5338_v38  ;;  %v1633_v24 = vcombine.high %v1625_v47, %v1625_v47  ;;  %v6295_v18 = vpop.permute.xlu1 %3487 }
 0x169   : > { %v6760_v52 = vrot.slane %v6223_v3, %v5691_v36  ;;  %v4448_v26 = vrot.slane %v1651_v62, 9  ;;  %v1995_v28 = vmax.f32 %v1650_v35, %v4446_v55  ;;  %v1996_v41 = vmax.f32 %v1649_v7, %v4447_v22  ;;  %v6299_v31 = vpop.permute.xlu0 %3475 }
 0x16a   : > { %v2905_v54 = vrot.slane %v1994_v43, %v5691_v36  ;;  %v1634_v50 = vcombine.high %v1632_v0, %v1632_v0  ;;  %v4441_v61 = vrot.slane %v1625_v47, 9  ;;  %v4442_v13 = vrot.slane %v1633_v24, 9 }
 0x16b   : > { %v2998_v12 = vsel %vm2962_vm5, %v6760_v52, %v2997_v21  ;;  %v1997_v44 = vmax.f32 %v1651_v62, %v4448_v26  ;;  %v2909_v51 = vrot.slane %v1995_v28, %v5691_v36  ;;  %v2913_v3 = vrot.slane %v1996_v41, %v5691_v36 }
 0x16c   : > { %3026 = vst [vmem:[%s5884_s16 + $0x28] sm:$0xff] %v2998_v12  ;;  %v4443_v60 = vrot.slane %v1632_v0, 9  ;;  %v4444_v23 = vrot.slane %v1634_v50, 9  ;;  %v1990_v15 = vmax.f32 %v1625_v47, %v4441_v61  ;;  %v1991_v35 = vmax.f32 %v1633_v24, %v4442_v13  ;;  %v6306_v21 = vpop.permute.xlu1 %4648 }
 0x16d   : > { %v1314_v7 = vmul.f32 0.1, %v1250_v63  ;;  %v2917_v55 = vrot.slane %v1997_v44, %v5691_v36  ;;  %vm1221_vm8 = vcmp.eq.s32.totalorder %v6011_v8, 1  ;;  %vm1220_vm9 = vcmp.eq.s32.totalorder %v6018_v39, 1  ;;  %v6311_v26 = vpop.permute.xlu0 %3499  ;;  %v6761_v8 = vld [vmem:[#allocation9_spill] sm:$0xff] }
 0x16e   : > { %v1992_v22 = vmax.f32 %v1632_v0, %v4443_v60  ;;  %v1993_v43 = vmax.f32 %v1634_v50, %v4444_v23  ;;  %v2889_v62 = vrot.slane %v1990_v15, %v5691_v36  ;;  %v2893_v52 = vrot.slane %v1991_v35, %v5691_v36 }
 0x16f   : > { %v1346_v12 = vsel %vm1282_vm7, %v1250_v63, %v1314_v7  ;;  %v1253_v24 = vsel %vm1221_vm8, %v6132_v29, 0.0  ;;  %v1252_v0 = vsel %vm1220_vm9, %v6047_v17, 0.0  ;;  %v3052_v39 = vrot.slane %v6033_v6, %v6761_v8 }
 0x170   : > { %v2897_v47 = vrot.slane %v1992_v22, %v5691_v36  ;;  %v2901_v28 = vrot.slane %v1993_v43, %v5691_v36  ;;  %v2999_v41 = vsel %vm2950_vm10, %v2893_v52, %v2889_v62  ;;  %vm1285_vm11 = vcmp.ge.f32.partialorder %v1253_v24, 0.0  ;;  %v6325_v6 = vpop.permute.xlu1 %3535 }
 0x171   : > { %v1317_v50 = vmul.f32 0.1, %v1253_v24  ;;  %vm1284_vm13 = vcmp.ge.f32.partialorder %v1252_v0, 0.0  ;;  %v1316_v63 = vmul.f32 0.1, %v1252_v0  ;;  %v3868_v13 = vrot.slane %v3052_v39, %v5691_v36  ;;  %6762 = vst [vmem:[#allocation6_spill] sm:$0xff] %v6325_v6 }
 0x172   : > { %v3000_v61 = vsel %vm2952_vm12, %v2897_v47, %v2999_v41  ;;  %v4626_v17 = vunpack.i.h.bf16 %v6040_v20  ;;  %v4625_v60 = vunpack.i.l.bf16 %v6040_v20  ;;  %v3076_v7 = vrot.slane %v6057_v27, %v6761_v8  ;;  %v6334_v47 = vpop.permute.xlu0 %3523 }
 0x173   : > { %v3001_v44 = vsel %vm2954_vm14, %v2901_v28, %v3000_v61  ;;  %v1349_v29 = vsel %vm1285_vm11, %v1253_v24, %v1317_v50  ;;  %v1348_v35 = vsel %vm1284_vm13, %v1252_v0, %v1316_v63  ;;  %6763 = vst [vmem:[#allocation5_spill] sm:$0xff] %v6334_v47 }
 0x174   : > { %v3002_v23 = vsel %vm2956_vm2, %v2905_v54, %v3001_v44  ;;  %v1397_v15 = vmax.f32 %v6268_v48, %v1349_v29  ;;  %v1396_v43 = vmax.f32 %v1346_v12, %v1348_v35  ;;  %v3088_v62 = vrot.slane %v4626_v17, %v6761_v8  ;;  %v6764_v44 = vld [vmem:[#allocation11_spill] sm:$0xff] }
 0x175   : > { %v3003_v22 = vsel %vm2958_vm3, %v2909_v51, %v3002_v23  ;;  %v3040_v52 = vrot.slane %v4625_v60, %v6761_v8  ;;  %v3876_v48 = vrot.slane %v3076_v7, %v5691_v36  ;;  %v3064_v29 = vrot.slane %v6764_v44, %v6761_v8 }
 0x176   : > { %v3004_v20 = vsel %vm2960_vm4, %v2913_v3, %v3003_v22  ;;  %v1669_v24 = vcombine.high %v1397_v15, %v1397_v15  ;;  %v1676_v54 = vrot.slane %v1397_v15, %v5338_v38  ;;  %v1652_v27 = vcombine.high %v1396_v43, %v1396_v43 }
 0x177   : > { %v3005_v0 = vsel %vm2962_vm5, %v2917_v55, %v3004_v20  ;;  %v1659_v51 = vrot.slane %v1396_v43, %v5338_v38  ;;  %v3880_v12 = vrot.slane %v3088_v62, %v5691_v36  ;;  %v3864_v50 = vrot.slane %v3040_v52, %v5691_v36  ;;  %v6348_v55 = vpop.permute.xlu1 %4653  ;;  %v6350_v62 = vpop.permute.xlu0 %3547 }
 0x178   : > { %v1683_v39 = vrot.slane %v1669_v24, %v5338_v38  ;;  %v1684_v28 = vcombine.high %v1676_v54, %v1676_v54  ;;  %v4453_v41 = vrot.slane %v1676_v54, 9  ;;  %3027 = vst [vmem:[%s5884_s16 + $0x30] sm:$0xff] %v3005_v0  ;;  %v1666_v3 = vrot.slane %v1652_v27, %v5338_v38  ;;  %6765 = vst [vmem:[#allocation3_spill] sm:$0xff] %v6348_v55 }
 0x179   : > { %v1667_v61 = vcombine.high %v1659_v51, %v1659_v51  ;;  %v4449_v63 = vrot.slane %v1659_v51, 9 }
 0x17a   : > { %v1685_v17 = vcombine.high %v1683_v39, %v1683_v39  ;;  %v4454_v60 = vrot.slane %v1684_v28, 9  ;;  %v4455_v23 = vrot.slane %v1683_v39, 9  ;;  %v2002_v15 = vmax.f32 %v1676_v54, %v4453_v41 }
 0x17b   : > { %v1668_v35 = vcombine.high %v1666_v3, %v1666_v3  ;;  %v4450_v7 = vrot.slane %v1667_v61, 9  ;;  %v4451_v22 = vrot.slane %v1666_v3, 9  ;;  %v1998_v43 = vmax.f32 %v1659_v51, %v4449_v63 }
 0x17c   : > { %v4456_v52 = vrot.slane %v1685_v17, 9  ;;  %v2003_v20 = vmax.f32 %v1684_v28, %v4454_v60  ;;  %v2004_v38 = vmax.f32 %v1683_v39, %v4455_v23  ;;  %v2937_v24 = vrot.slane %v2002_v15, %v5691_v36  ;;  %v6360_v60 = vpop.permute.xlu1 %3715  ;;  %v6767_v15 = vld [vmem:[#allocation16_spill] sm:$0xff] }
 0x17d   : > { %v4452_v0 = vrot.slane %v1668_v35, 9  ;;  %v1999_v27 = vmax.f32 %v1667_v61, %v4450_v7  ;;  %v2000_v44 = vmax.f32 %v1666_v3, %v4451_v22  ;;  %v2921_v55 = vrot.slane %v1998_v43, %v5691_v36 }
 0x17e   : > { %v2005_v47 = vmax.f32 %v1685_v17, %v4456_v52  ;;  %v2941_v6 = vrot.slane %v2003_v20, %v5691_v36  ;;  %v2945_v54 = vrot.slane %v2004_v38, %v5691_v36  ;;  %v3872_v41 = vrot.slane %v3064_v29, %v5691_v36  ;;  %v6766_v17 = vld [vmem:[#allocation4_spill] sm:$0xff] }
 0x17f   : > { %v2001_v51 = vmax.f32 %v1668_v35, %v4452_v0  ;;  %v2925_v63 = vrot.slane %v1999_v27, %v5691_v36  ;;  %v2929_v28 = vrot.slane %v2000_v44, %v5691_v36  ;;  %v4117_v39 = vsel %vm2950_vm10, %v3868_v13, %v3864_v50  ;;  %v6372_v50 = vpop.permute.xlu0 %3619 }
 0x180   : > { %v2949_v3 = vrot.slane %v2005_v47, %v5691_v36  ;;  %v4118_v61 = vsel %vm2952_vm12, %v3872_v41, %v4117_v39  ;;  %v3112_v23 = vrot.slane %v6766_v17, %v6761_v8  ;;  %v3100_v7 = vrot.slane %v6767_v15, %v6761_v8 }
 0x181   : > { %v2933_v29 = vrot.slane %v2001_v51, %v5691_v36  ;;  %v3006_v35 = vsel %vm2950_vm10, %v2925_v63, %v2921_v55  ;;  %v4119_v22 = vsel %vm2954_vm14, %v3876_v48, %v4118_v61  ;;  %v4631_v13 = vunpack.i.h.bf16 %v6082_v53 }
 0x182   : > { %v3007_v47 = vsel %vm2952_vm12, %v2929_v28, %v3006_v35  ;;  %v3888_v43 = vrot.slane %v3112_v23, %v5691_v36  ;;  %v3884_v52 = vrot.slane %v3100_v7, %v5691_v36  ;;  %v4120_v20 = vsel %vm2956_vm2, %v3880_v12, %v4119_v22 }
 0x183   : > { %v3008_v38 = vsel %vm2954_vm14, %v2933_v29, %v3007_v47  ;;  %v3184_v0 = vrot.slane %v4631_v13, %v6761_v8  ;;  %v4630_v55 = vunpack.i.l.bf16 %v6082_v53  ;;  %v3124_v48 = vrot.slane %v6087_v4, %v6761_v8  ;;  %v6411_v15 = vpop.permute.xlu0 %3631 }
 0x184   : > { %v3009_v27 = vsel %vm2956_vm2, %v2937_v24, %v3008_v38  ;;  %v4121_v44 = vsel %vm2958_vm3, %v3884_v52, %v4120_v20  ;;  %v3160_v41 = vrot.slane %v6102_v59, %v6761_v8  ;;  %v3148_v51 = vrot.slane %v6106_v58, %v6761_v8  ;;  %v6400_v59 = vpop.permute.xlu1 %3727 }
 0x185   : > { %v3010_v12 = vsel %vm2958_vm3, %v2941_v6, %v3009_v27  ;;  %v3912_v63 = vrot.slane %v3184_v0, %v5691_v36  ;;  %v3136_v53 = vrot.slane %v4630_v55, %v6761_v8  ;;  %v3892_v4 = vrot.slane %v3124_v48, %v5691_v36 }
 0x186   : > { %v3011_v58 = vsel %vm2960_vm4, %v2945_v54, %v3010_v12  ;;  %v4122_v24 = vsel %vm2960_vm4, %v3888_v43, %v4121_v44  ;;  %v3904_v6 = vrot.slane %v3160_v41, %v5691_v36  ;;  %v3900_v28 = vrot.slane %v3148_v51, %v5691_v36 }
 0x187   : > { %v3012_v39 = vsel %vm2962_vm5, %v2949_v3, %v3011_v58  ;;  %v3896_v61 = vrot.slane %v3136_v53, %v5691_v36  ;;  %v4123_v17 = vsel %vm2962_vm5, %v3892_v4, %v4122_v24  ;;  %v3196_v23 = vrot.slane %v6122_v25, %v6761_v8  ;;  %v6449_v51 = vpop.permute.xlu0 %3643 }
 0x188   : > { %3028 = vst [vmem:[%s5884_s16 + $0x38] sm:$0xff] %v3012_v39  ;;  %4181 = vst [vmem:[%s6397_s23] sm:$0xff] %v4123_v17  ;;  %v3172_v54 = vrot.slane %v6127_v45, %v6761_v8  ;;  %v3220_v7 = vrot.slane %v6144_v42, %v6761_v8  ;;  %v3208_v3 = vrot.slane %v6147_v57, %v6761_v8  ;;  %v4636_v22 = vunpack.i.h.bf16 %v6163_v1  ;;  %v6436_v38 = vpop.permute.xlu1 %3739 }
 0x189   : > { %v3244_v29 = vrot.slane %v6159_v11, %v6761_v8  ;;  %v4124_v35 = vsel %vm2950_vm10, %v3900_v28, %v3896_v61  ;;  %v3916_v25 = vrot.slane %v3196_v23, %v5691_v36  ;;  %v4635_v13 = vunpack.i.l.bf16 %v6163_v1 }
 0x18a   : > { %v4125_v47 = vsel %vm2952_vm12, %v3904_v6, %v4124_v35  ;;  %v3908_v45 = vrot.slane %v3172_v54, %v5691_v36  ;;  %v3924_v42 = vrot.slane %v3220_v7, %v5691_v36  ;;  %v3920_v43 = vrot.slane %v3208_v3, %v5691_v36 }
 0x18b   : > { %v3932_v57 = vrot.slane %v3244_v29, %v5691_v36  ;;  %v3280_v11 = vrot.slane %v4636_v22, %v6761_v8  ;;  %v3232_v52 = vrot.slane %v4635_v13, %v6761_v8  ;;  %v3268_v20 = vrot.slane %v6176_v34, %v6761_v8  ;;  %v6482_v22 = vpop.permute.xlu0 %4658 }
 0x18c   : > { %v4126_v1 = vsel %vm2954_vm14, %v3908_v45, %v4125_v47  ;;  %v3256_v0 = vrot.slane %v6182_v19, %v6761_v8  ;;  %v3304_v55 = vrot.slane %v6191_v49, %v6761_v8  ;;  %v3292_v48 = vrot.slane %v6194_v16, %v6761_v8  ;;  %v6471_v54 = vpop.permute.xlu1 %3571 }
 0x18d   : > { %v4127_v27 = vsel %vm2956_vm2, %v3912_v63, %v4126_v1  ;;  %v3944_v44 = vrot.slane %v3280_v11, %v5691_v36  ;;  %v3928_v34 = vrot.slane %v3232_v52, %v5691_v36  ;;  %v3940_v41 = vrot.slane %v3268_v20, %v5691_v36 }
 0x18e   : > { %v4128_v12 = vsel %vm2958_vm3, %v3916_v25, %v4127_v27  ;;  %v3936_v19 = vrot.slane %v3256_v0, %v5691_v36  ;;  %v3952_v49 = vrot.slane %v3304_v55, %v5691_v36  ;;  %v3948_v53 = vrot.slane %v3292_v48, %v5691_v36 }
 0x18f   : > { %v4129_v16 = vsel %vm2960_vm4, %v3920_v43, %v4128_v12  ;;  %v4131_v63 = vsel %vm2950_vm10, %v3932_v57, %v3928_v34  ;;  %v4641_v4 = vunpack.i.h.bf16 %v6200_v2  ;;  %v4640_v58 = vunpack.i.l.bf16 %v6200_v2 }
 0x190   : > { %v4130_v24 = vsel %vm2962_vm5, %v3924_v42, %v4129_v16  ;;  %v4132_v6 = vsel %vm2952_vm12, %v3936_v19, %v4131_v63  ;;  %v3316_v28 = vrot.slane %v6205_v9, %v6761_v8  ;;  %v3352_v39 = vrot.slane %v6210_v10, %v6761_v8  ;;  %v6506_v48 = vpop.permute.xlu1 %3763  ;;  %v6519_v19 = vpop.permute.xlu0 %3667 }
 0x191   : > { %4182 = vst [vmem:[%s6397_s23 + $0x8] sm:$0xff] %v4130_v24  ;;  %v4133_v61 = vsel %vm2954_vm14, %v3940_v41, %v4132_v6  ;;  %v3376_v17 = vrot.slane %v4641_v4, %v6761_v8  ;;  %v3328_v23 = vrot.slane %v4640_v58, %v6761_v8  ;;  %v3340_v2 = vrot.slane %v6218_v46, %v6761_v8 }
 0x192   : > { %v4134_v7 = vsel %vm2956_vm2, %v3944_v44, %v4133_v61  ;;  %v3956_v3 = vrot.slane %v3316_v28, %v5691_v36  ;;  %v3968_v9 = vrot.slane %v3352_v39, %v5691_v36  ;;  %v3388_v10 = vrot.slane %v6235_v32, %v6761_v8  ;;  %v6768_v28 = vld [vmem:[#allocation6_spill] sm:$0xff] }
 0x193   : > { %v4135_v29 = vsel %vm2958_vm3, %v3948_v53, %v4134_v7  ;;  %v3976_v35 = vrot.slane %v3376_v17, %v5691_v36  ;;  %v3960_v25 = vrot.slane %v3328_v23, %v5691_v36  ;;  %v3964_v46 = vrot.slane %v3340_v2, %v5691_v36  ;;  %v6769_v23 = vld [vmem:[#allocation5_spill] sm:$0xff]  ;;  %v6770_v7 = vld [vmem:[#allocation3_spill] sm:$0xff] }
 0x194   : > { %v4136_v13 = vsel %vm2960_vm4, %v3952_v49, %v4135_v29  ;;  %v3980_v47 = vrot.slane %v3388_v10, %v5691_v36  ;;  %v3364_v45 = vrot.slane %v6241_v5, %v6761_v8  ;;  %v3412_v32 = vrot.slane %v6248_v56, %v6761_v8 }
 0x195   : > { %v4137_v42 = vsel %vm2962_vm5, %v3956_v3, %v4136_v13  ;;  %v4138_v43 = vsel %vm2950_vm10, %v3964_v46, %v3960_v25  ;;  %v3400_v57 = vrot.slane %v6250_v40, %v6761_v8  ;;  %v3436_v11 = vrot.slane %v6259_v37, %v6761_v8 }
 0x196   : > { %4183 = vst [vmem:[%s6397_s23 + $0x10] sm:$0xff] %v4137_v42  ;;  %v4139_v52 = vsel %vm2952_vm12, %v3968_v9, %v4138_v43  ;;  %v3972_v20 = vrot.slane %v3364_v45, %v5691_v36  ;;  %v3988_v5 = vrot.slane %v3412_v32, %v5691_v36  ;;  %v4646_v1 = vunpack.i.h.bf16 %v6263_v14  ;;  %v6541_v9 = vpop.permute.xlu1 %3679 }
 0x197   : > { %v3984_v56 = vrot.slane %v3400_v57, %v5691_v36  ;;  %v3996_v0 = vrot.slane %v3436_v11, %v5691_v36  ;;  %v4645_v55 = vunpack.i.l.bf16 %v6263_v14  ;;  %v3460_v40 = vrot.slane %v6273_v30, %v6761_v8 }
 0x198   : > { %v4140_v37 = vsel %vm2954_vm14, %v3972_v20, %v4139_v52  ;;  %v3472_v27 = vrot.slane %v4646_v1, %v6761_v8  ;;  %v3448_v44 = vrot.slane %v6280_v33, %v6761_v8  ;;  %v3496_v34 = vrot.slane %v6295_v18, %v6761_v8 }
 0x199   : > { %v4141_v41 = vsel %vm2956_vm2, %v3976_v35, %v4140_v37  ;;  %v3424_v12 = vrot.slane %v4645_v55, %v6761_v8  ;;  %v4004_v14 = vrot.slane %v3460_v40, %v5691_v36  ;;  %v3484_v30 = vrot.slane %v6299_v31, %v6761_v8 }
 0x19a   : > { %v4142_v49 = vsel %vm2958_vm3, %v3980_v47, %v4141_v41  ;;  %v4008_v53 = vrot.slane %v3472_v27, %v5691_v36  ;;  %v4000_v33 = vrot.slane %v3448_v44, %v5691_v36  ;;  %v4016_v18 = vrot.slane %v3496_v34, %v5691_v36  ;;  %v3584_v47 = vpop.permute.xlu0 %3583 }
 0x19b   : > { %v4143_v16 = vsel %vm2960_vm4, %v3984_v56, %v4142_v49  ;;  %v3992_v63 = vrot.slane %v3424_v12, %v5691_v36  ;;  %v4012_v4 = vrot.slane %v3484_v30, %v5691_v36  ;;  %v4651_v58 = vunpack.i.h.bf16 %v6306_v21 }
 0x19c   : > { %v4144_v31 = vsel %vm2962_vm5, %v3988_v5, %v4143_v16  ;;  %v4650_v24 = vunpack.i.l.bf16 %v6306_v21  ;;  %v3508_v6 = vrot.slane %v6311_v26, %v6761_v8  ;;  %v3544_v39 = vrot.slane %v6768_v28, %v6761_v8 }
 0x19d   : > { %4184 = vst [vmem:[%s6397_s23 + $0x18] sm:$0xff] %v4144_v31  ;;  %v4145_v61 = vsel %vm2950_vm10, %v3996_v0, %v3992_v63  ;;  %v3568_v17 = vrot.slane %v4651_v58, %v6761_v8  ;;  %v3532_v2 = vrot.slane %v6769_v23, %v6761_v8  ;;  %v4656_v3 = vunpack.i.h.bf16 %v6770_v7 }
 0x19e   : > { %v4146_v21 = vsel %vm2952_vm12, %v4000_v33, %v4145_v61  ;;  %v3520_v10 = vrot.slane %v4650_v24, %v6761_v8  ;;  %v4020_v26 = vrot.slane %v3508_v6, %v5691_v36  ;;  %v4032_v29 = vrot.slane %v3544_v39, %v5691_v36  ;;  %v3776_v49 = vpop.permute.xlu0 %3775 }
 0x19f   : > { %v4147_v35 = vsel %vm2954_vm14, %v4004_v14, %v4146_v21  ;;  %v4040_v25 = vrot.slane %v3568_v17, %v5691_v36  ;;  %v4028_v46 = vrot.slane %v3532_v2, %v5691_v36  ;;  %v3712_v13 = vrot.slane %v4656_v3, %v6761_v8 }
 0x1a0   : > { %v4148_v45 = vsel %vm2956_vm2, %v4008_v53, %v4147_v35  ;;  %v4024_v32 = vrot.slane %v3520_v10, %v5691_v36  ;;  %v4655_v42 = vunpack.i.l.bf16 %v6770_v7  ;;  %v3556_v43 = vrot.slane %v6350_v62, %v6761_v8 }
 0x1a1   : > { %v4149_v57 = vsel %vm2958_vm3, %v4012_v4, %v4148_v45  ;;  %v4088_v11 = vrot.slane %v3712_v13, %v5691_v36  ;;  %v3724_v52 = vrot.slane %v6360_v60, %v6761_v8  ;;  %v3628_v20 = vrot.slane %v6372_v50, %v6761_v8  ;;  %v3596_v60 = vpop.permute.xlu1 %3595 }
 0x1a2   : > { %v4150_v5 = vsel %vm2960_vm4, %v4016_v18, %v4149_v57  ;;  %v4152_v1 = vsel %vm2950_vm10, %v4028_v46, %v4024_v32  ;;  %v3616_v56 = vrot.slane %v4655_v42, %v6761_v8  ;;  %v4036_v0 = vrot.slane %v3556_v43, %v5691_v36  ;;  %v3692_v21 = vpop.permute.xlu0 %3691 }
 0x1a3   : > { %v4151_v62 = vsel %vm2962_vm5, %v4020_v26, %v4150_v5  ;;  %v4153_v55 = vsel %vm2952_vm12, %v4032_v29, %v4152_v1  ;;  %v4092_v40 = vrot.slane %v3724_v52, %v5691_v36  ;;  %v4060_v37 = vrot.slane %v3628_v20, %v5691_v36 }
 0x1a4   : > { %4185 = vst [vmem:[%s6397_s23 + $0x20] sm:$0xff] %v4151_v62  ;;  %v4056_v50 = vrot.slane %v3616_v56, %v5691_v36  ;;  %v4154_v27 = vsel %vm2954_vm14, %v4036_v0, %v4153_v55  ;;  %v3736_v44 = vrot.slane %v6400_v59, %v6761_v8  ;;  %v3640_v34 = vrot.slane %v6411_v15, %v6761_v8 }
 0x1a5   : > { %v4166_v41 = vsel %vm2950_vm10, %v4092_v40, %v4088_v11  ;;  %v3748_v12 = vrot.slane %v6436_v38, %v6761_v8  ;;  %v3652_v14 = vrot.slane %v6449_v51, %v6761_v8  ;;  %v3580_v30 = vrot.slane %v6471_v54, %v6761_v8  ;;  %v3788_v39 = vpop.permute.xlu1 %3787 }
 0x1a6   : > { %v4159_v53 = vsel %vm2950_vm10, %v4060_v37, %v4056_v50  ;;  %v4096_v33 = vrot.slane %v3736_v44, %v5691_v36  ;;  %v4064_v59 = vrot.slane %v3640_v34, %v5691_v36  ;;  %v4155_v15 = vsel %vm2956_vm2, %v4040_v25, %v4154_v27 }
 0x1a7   : > { %v4100_v18 = vrot.slane %v3748_v12, %v5691_v36  ;;  %v4068_v16 = vrot.slane %v3652_v14, %v5691_v36  ;;  %v4044_v38 = vrot.slane %v3580_v30, %v5691_v36  ;;  %v4661_v51 = vunpack.i.h.bf16 %v6482_v22 }
 0x1a8   : > { %v4167_v63 = vsel %vm2952_vm12, %v4096_v33, %v4166_v41  ;;  %v4160_v54 = vsel %vm2952_vm12, %v4064_v59, %v4159_v53  ;;  %v4660_v4 = vunpack.i.l.bf16 %v6482_v22  ;;  %v3772_v58 = vrot.slane %v6506_v48, %v6761_v8 }
 0x1a9   : > { %v4168_v31 = vsel %vm2954_vm14, %v4100_v18, %v4167_v63  ;;  %v4161_v24 = vsel %vm2954_vm14, %v4068_v16, %v4160_v54  ;;  %v4156_v6 = vsel %vm2958_vm3, %v4044_v38, %v4155_v15  ;;  %v3760_v28 = vrot.slane %v4661_v51, %v6761_v8 }
 0x1aa   : > { %v3664_v61 = vrot.slane %v4660_v4, %v6761_v8  ;;  %v4108_v17 = vrot.slane %v3772_v58, %v5691_v36  ;;  %v3676_v23 = vrot.slane %v6519_v19, %v6761_v8  ;;  %v3688_v22 = vrot.slane %v6541_v9, %v6761_v8 }
 0x1ab   : > { %v4104_v48 = vrot.slane %v3760_v28, %v5691_v36  ;;  %v3592_v2 = vrot.slane %v3584_v47, %v6761_v8  ;;  %v3604_v7 = vrot.slane %v3596_v60, %v6761_v8  ;;  %v3784_v3 = vrot.slane %v3776_v49, %v6761_v8 }
 0x1ac   : > { %v4072_v10 = vrot.slane %v3664_v61, %v5691_v36  ;;  %v4076_v26 = vrot.slane %v3676_v23, %v5691_v36  ;;  %v4080_v29 = vrot.slane %v3688_v22, %v5691_v36  ;;  %v3796_v19 = vrot.slane %v3788_v39, %v6761_v8 }
 0x1ad   : > { %v4169_v9 = vsel %vm2956_vm2, %v4104_v48, %v4168_v31  ;;  %v4048_v35 = vrot.slane %v3592_v2, %v5691_v36  ;;  %v4052_v25 = vrot.slane %v3604_v7, %v5691_v36  ;;  %v4112_v46 = vrot.slane %v3784_v3, %v5691_v36 }
 0x1ae   : > { %v4170_v13 = vsel %vm2958_vm3, %v4108_v17, %v4169_v9  ;;  %v4162_v47 = vsel %vm2956_vm2, %v4072_v10, %v4161_v24  ;;  %v4116_v45 = vrot.slane %v3796_v19, %v5691_v36  ;;  %v3700_v32 = vrot.slane %v3692_v21, %v6761_v8 }
 0x1af   : > { %v4157_v42 = vsel %vm2960_vm4, %v4048_v35, %v4156_v6  ;;  %v4171_v43 = vsel %vm2960_vm4, %v4112_v46, %v4170_v13  ;;  %v4163_v57 = vsel %vm2958_vm3, %v4076_v26, %v4162_v47 }
 0x1b0   : > { %v4158_v11 = vsel %vm2962_vm5, %v4052_v25, %v4157_v42  ;;  %v4172_v52 = vsel %vm2962_vm5, %v4116_v45, %v4171_v43  ;;  %v4084_v20 = vrot.slane %v3700_v32, %v5691_v36  ;;  %v4164_v5 = vsel %vm2960_vm4, %v4080_v29, %v4163_v57 }
 0x1b1   : > { %4186 = vst [vmem:[%s6397_s23 + $0x28] sm:$0xff] %v4158_v11  ;;  %4188 = vst [vmem:[%s6397_s23 + $0x38] sm:$0xff] %v4172_v52 }
 0x1b2   : > { %v4165_v1 = vsel %vm2962_vm5, %v4084_v20, %v4164_v5 }
 0x1b3   : > { %4187 = vst [vmem:[%s6397_s23 + $0x30] sm:$0xff] %v4165_v1 }
 0x1b4 PF: > { %s16_s20 = sadd.s32 1, %s4767_s20   ;;  %s6771_s18 = smov %s4763_s19 }
 0x1b5   : > { %p13_p5 = scmp.ge.s32.totalorder %s16_s20, 4   ;;  %s6772_s19 = smov %s6774_s21 }
 0x1b7   :  { %15 = sbr.rel (!%p13_p5) target bundleno = 2 (0x2), region = 81 }

</bundles_post_ra>
